<compile_context>
chip_gen: v5e
topology: v5e:2x2
jax: 0.10.0
libtpu: 0.0.40
codegen_flags: <defaults>
</compile_context>

<pallas_src>
import functools

import jax
import jax.numpy as jnp
from jax import lax
from jax.experimental import pallas as pl
from jax.experimental.pallas import tpu as pltpu


# ----------------------------- kernel helpers ---------------------------------

def _dot_nn(a, b):
    """a @ b (MXU, f32 accumulation)."""
    return lax.dot_general(a, b, (((1,), (0,)), ((), ())),
                           preferred_element_type=jnp.float32)


def _dot_nt(a, b):
    """a @ b.T via dot_general dimension_numbers (no XLU transpose)."""
    return lax.dot_general(a, b, (((1,), (1,)), ((), ())),
                           preferred_element_type=jnp.float32)


def _dot_tn(a, b):
    """a.T @ b via dot_general dimension_numbers (no XLU transpose)."""
    return lax.dot_general(a, b, (((0,), (0,)), ((), ())),
                           preferred_element_type=jnp.float32)


def _softmax_probs(z):
    m = jnp.max(z, axis=-1, keepdims=True)
    e = jnp.exp(z - m)
    return e * pl.reciprocal(jnp.sum(e, axis=-1, keepdims=True), approx=True)


def _softmax_with_logp(z):
    m = jnp.max(z, axis=-1, keepdims=True)
    e = jnp.exp(z - m)
    s = jnp.sum(e, axis=-1, keepdims=True)
    p = e * pl.reciprocal(s, approx=True)
    logp = (z - m) - jnp.log(s)          # exact path for the reported loss
    return p, logp


def _softmax_jvp(p, a):
    """Per-row (diag(p) - p p^T) @ a — softmax Jacobian-vector product."""
    return p * a - p * jnp.sum(p * a, axis=-1, keepdims=True)


# ----------------------------- fused Pallas kernel -----------------------------

def _fused_task_kernel(s_pooled_ref, s_lab_ref, q_pooled_ref, q_lab_ref,
                       wmeta_ref, w0_ref, b0_ref,
                       loss_ref, acc_ref, grad_ref, w_out_ref, b_out_ref,
                       *, n_iters, n_batches, bs, lr, reg, hq, nlr, num_tasks):
    """One grid step == one task: meta projection -> inner SGD loop -> query
    CE/accuracy -> AdamBO hypergradient.  Adapter params, hypergradient mean,
    and loss/acc means live in resident output blocks across the task grid."""
    t = pl.program_id(0)

    @pl.when(t == 0)
    def _init():
        w_out_ref[...] = w0_ref[...]
        b_out_ref[...] = b0_ref[...]
        grad_ref[...] = jnp.zeros_like(grad_ref)
        loss_ref[0, 0] = jnp.float32(0.0)
        acc_ref[0, 0] = jnp.float32(0.0)

    wmeta = wmeta_ref[...]                                       # [H, H]
    s_pooled = s_pooled_ref[0]                                   # [Ns, H]
    q_pooled = q_pooled_ref[0]                                   # [Bq, H]
    s_lab = s_lab_ref[0]                                         # [Ns, 1] int32
    q_lab = q_lab_ref[0]                                         # [Bq, 1] int32

    ns = s_pooled.shape[0]
    bq = q_pooled.shape[0]
    l = w0_ref.shape[0]
    inv_bs = 1.0 / float(bs)
    inv_bq = 1.0 / float(bq)
    inv_nt = 1.0 / float(num_tasks)

    # one-hot targets built in-kernel from int32 labels (no HBM one-hot buffers)
    s_onehot = (s_lab == lax.broadcasted_iota(jnp.int32, (ns, l), 1)
                ).astype(jnp.float32)                            # [Ns, L]
    q_onehot = (q_lab == lax.broadcasted_iota(jnp.int32, (bq, l), 1)
                ).astype(jnp.float32)                            # [Bq, L]

    # meta projection, once per task (tiny matmuls — far below one MXU tile;
    # at realistic sizes these would be tiled/batched contractions).
    feats = _dot_nn(s_pooled, wmeta)                             # [Ns, H]
    q_feats = _dot_nn(q_pooled, wmeta)                           # [Bq, H]

    # ---- inner SGD loop (fully unrolled; adapter params stay in vregs) ----
    # deterministic contiguous mini-batches via precomputed masks.
    # TODO(synk): RandomSampler shuffling / trailing partial batch omitted.
    row = lax.broadcasted_iota(jnp.int32, (ns, 1), 0)
    sel_masks = [
        jnp.logical_and(row >= bi * bs, row < (bi + 1) * bs).astype(jnp.float32)
        for bi in range(n_batches)
    ]
    w = w_out_ref[...]                                           # [L, H]
    b = b_out_ref[...]                                           # [1, L]
    for i in range(n_iters):
        sel = sel_masks[i % n_batches]
        p = _softmax_probs(_dot_nt(feats, w) + b)                # [Ns, L]
        dl = sel * (p - s_onehot) * inv_bs                       # zero outside batch
        dw = _dot_tn(dl, feats) + 2.0 * reg * w
        db = jnp.sum(dl, axis=0, keepdims=True) + 2.0 * reg * b
        w = w - lr * dw
        b = b - lr * db
    w_out_ref[...] = w
    b_out_ref[...] = b

    # ---- query pass: CE loss (exact logp), accuracy, dlogits ----
    pq, logpq = _softmax_with_logp(_dot_nt(q_feats, w) + b)      # [Bq, L]
    ce = -jnp.sum(q_onehot * logpq) * inv_bq
    loss_ref[0, 0] = loss_ref[0, 0] + ce * inv_nt

    # in-kernel argmax (torch.argmax tie-break = lowest index) + accuracy
    col = lax.broadcasted_iota(jnp.int32, (bq, l), 1).astype(jnp.float32)
    pmax = jnp.max(pq, axis=-1, keepdims=True)
    pred = jnp.min(jnp.where(pq >= pmax, col, jnp.float32(l)),
                   axis=-1, keepdims=True)                       # [Bq, 1]
    correct = (pred == q_lab.astype(jnp.float32)).astype(jnp.float32)
    acc_ref[0, 0] = acc_ref[0, 0] + jnp.sum(correct) * inv_bq * inv_nt

    q_dl = (pq - q_onehot) * inv_bq                              # [Bq, L]

    # ---- support probs of the LAST inner batch under the final adapter ----
    s_feats_last = feats[(n_batches - 1) * bs: n_batches * bs]   # static slice
    ps = _softmax_probs(_dot_nt(s_feats_last, w) + b)            # [bs, L]

    # ---- Fy -> v0 and Fx ----
    vw = _dot_tn(q_dl, q_feats)                                  # [L, H]
    vb = jnp.sum(q_dl, axis=0, keepdims=True)                    # [1, L]
    fx = _dot_tn(q_pooled, _dot_nn(q_dl, w))                     # [H, H]

    # ---- Neumann series: v_k = (I - nlr * H_support) v_{k-1} (unrolled) ----
    zw = jnp.zeros_like(vw)
    zb = jnp.zeros_like(vb)
    for _ in range(hq):
        dz = _dot_nt(s_feats_last, vw) + vb                      # [bs, L]
        u = _softmax_jvp(ps, dz) * inv_bs
        hw = _dot_tn(u, s_feats_last) + 2.0 * reg * vw
        hb = jnp.sum(u, axis=0, keepdims=True) + 2.0 * reg * vb
        vw = vw - nlr * hw
        vb = vb - nlr * hb
        zw = zw + vw
        zb = zb + vb
    vq_w = nlr * (vw + zw)
    vq_b = nlr * (vb + zb)

    # ---- Gyxv = d(-Gy_q . v_Q)/d w_meta (L2 part of Gy_q is meta-independent);
    #      accumulate the mean hypergradient (Fx + Gyxv) across tasks ----
    a = _dot_nt(q_feats, vq_w) + vq_b                            # [Bq, L]
    u = _softmax_jvp(pq, a) * inv_bq
    ds_dx = _dot_nn(q_dl, vq_w) + _dot_nn(u, w)                  # [Bq, H]
    grad_ref[...] = grad_ref[...] + (fx - _dot_tn(q_pooled, ds_dx)) * inv_nt
    # TODO(synk): hypergradient w.r.t. the (frozen) embedding table not propagated.


# ----------------------------- kernel wrapper -----------------------------------

def pallas_fused_forward(s_pooled, s_lab, q_pooled, q_lab, w_meta, w0, b0,
                         *, n_iters, n_batches, bs, lr, reg, hq, nlr):
    nt, ns, h = s_pooled.shape
    bq = q_pooled.shape[1]
    l = w0.shape[0]
    kern = functools.partial(_fused_task_kernel, n_iters=n_iters,
                             n_batches=n_batches, bs=bs, lr=lr, reg=reg,
                             hq=hq, nlr=nlr, num_tasks=nt)
    smem = functools.partial(pl.BlockSpec, memory_space=pltpu.MemorySpace.SMEM)
    loss, acc, grad, w_new, b_new = pl.pallas_call(
        kern,
        out_shape=(
            jax.ShapeDtypeStruct((1, 1), jnp.float32),   # mean query CE loss
            jax.ShapeDtypeStruct((1, 1), jnp.float32),   # mean query accuracy
            jax.ShapeDtypeStruct((h, h), jnp.float32),   # mean hypergradient
            jax.ShapeDtypeStruct((l, h), jnp.float32),   # final adapter W
            jax.ShapeDtypeStruct((1, l), jnp.float32),   # final adapter b
        ),
        grid=(nt,),
        in_specs=[
            pl.BlockSpec((1, ns, h), lambda t: (t, 0, 0)),   # support pooled
            pl.BlockSpec((1, ns, 1), lambda t: (t, 0, 0)),   # support labels
            pl.BlockSpec((1, bq, h), lambda t: (t, 0, 0)),   # query pooled
            pl.BlockSpec((1, bq, 1), lambda t: (t, 0, 0)),   # query labels
            pl.BlockSpec((h, h), lambda t: (0, 0)),          # w_meta (resident)
            pl.BlockSpec((l, h), lambda t: (0, 0)),          # adapter W init
            pl.BlockSpec((1, l), lambda t: (0, 0)),          # adapter b init
        ],
        out_specs=(
            smem((1, 1), lambda t: (0, 0)),
            smem((1, 1), lambda t: (0, 0)),
            pl.BlockSpec((h, h), lambda t: (0, 0)),
            pl.BlockSpec((l, h), lambda t: (0, 0)),
            pl.BlockSpec((1, l), lambda t: (0, 0)),
        ),
        # Task axis carries adapter state -> strictly serial ("arbitrary").
        compiler_params=pltpu.CompilerParams(
            dimension_semantics=("arbitrary",)),
    )(s_pooled, s_lab, q_pooled, q_lab, w_meta, w0, b0)
    return loss[0, 0], acc[0, 0], grad, w_new, b_new


# ------------------------- single jitted forward --------------------------------

def _pool(embedding, ids, mask):
    # TODO(synk): embedding gather + masked mean pool kept in XLA (no clean
    # Pallas gather win at these shapes).
    emb = jnp.take(embedding, ids, axis=0)                       # [T, B, S, H]
    m = mask.astype(jnp.float32)[..., None]
    return jnp.sum(emb * m, axis=-2) / jnp.maximum(jnp.sum(m, axis=-2), 1.0)


def _forward_impl(embedding, w_meta, adapter_w, adapter_b, adam_m, adam_v, adam_t,
                  s_ids, s_mask, s_lab, q_ids, q_mask, q_lab,
                  *, n_iters, n_batches, bs, inner_lr, reg, nlr, hq,
                  training, outer_lr, eps):
    s_pooled = _pool(embedding, s_ids, s_mask)                   # [T, Ns, H]
    q_pooled = _pool(embedding, q_ids, q_mask)                   # [T, Bq, H]

    loss, acc, grad, w_new, b_new = pallas_fused_forward(
        s_pooled, s_lab[..., None].astype(jnp.int32),
        q_pooled, q_lab[..., None].astype(jnp.int32),
        w_meta, adapter_w, adapter_b,
        n_iters=n_iters, n_batches=n_batches, bs=bs,
        lr=inner_lr, reg=reg, hq=hq, nlr=nlr)

    if training:
        # torch.optim.Adam(betas=(0.9,0.999), weight_decay=0.01, eps=lambd)
        b1, b2, wd = 0.9, 0.999, 0.01
        g = grad + wd * w_meta
        m_new = b1 * adam_m + (1.0 - b1) * g
        v_new = b2 * adam_v + (1.0 - b2) * g * g
        mhat = m_new / (1.0 - b1 ** adam_t)
        vhat = v_new / (1.0 - b2 ** adam_t)
        w_meta_new = w_meta - outer_lr * mhat / (jnp.sqrt(vhat) + eps)
    else:
        w_meta_new, m_new, v_new = w_meta, adam_m, adam_v
    return acc, loss, w_new, b_new, w_meta_new, m_new, v_new


# ------------------------------- Learner ---------------------------------------

class Learner:
    """JAX/Pallas re-implementation of methods/adambo.py::Learner.forward."""

    def __init__(self, args):
        self.args = args
        self.num_labels = args.num_labels
        self.inner_batch_size = args.inner_batch_size
        self.outer_update_lr = args.outer_update_lr
        self.inner_update_lr = args.inner_update_lr
        self.inner_update_step = args.inner_update_step
        self.y_warm_start = args.y_warm_start
        self.neumann_lr = 1e-4
        self.reg_const = 1e-4

        H, L, V = args.hidden_size, args.num_labels, args.vocab_size
        k = jax.random.PRNGKey(42)
        ke, km, kw = jax.random.split(k, 3)
        # TODO(synk): BertForSequenceClassification (8-layer transformer) replaced by
        # a deterministic embedding + masked-mean-pool + linear-projection meta model.
        self.embedding = jax.random.normal(ke, (V, H), jnp.float32) * 0.02   # frozen
        self.w_meta = jax.random.normal(km, (H, H), jnp.float32) / jnp.sqrt(H)
        self.adapter_w = jax.random.normal(kw, (L, H), jnp.float32) * 0.02
        self.adapter_b = jnp.zeros((1, L), jnp.float32)
        # Adam (outer) state for the meta projection
        self.adam_m = jnp.zeros_like(self.w_meta)
        self.adam_v = jnp.zeros_like(self.w_meta)
        self.adam_t = 0

        # One jit / one fused pallas_call per forward (all tasks folded into the
        # kernel's task grid; outer Adam update fused into the same jit).
        self._forward = jax.jit(
            _forward_impl,
            static_argnames=("n_iters", "n_batches", "bs", "inner_lr", "reg",
                             "nlr", "hq", "training", "outer_lr", "eps"))

    def forward(self, batch_tasks, training=True, step=0, epoch=0):
        num_task = len(batch_tasks)
        n_steps = (self.y_warm_start if (epoch == 0 or not training)
                   else self.inner_update_step)

        # Stack all tasks (fixed [T, Ns, ...] shapes -> one compile, one dispatch).
        s_ids = jnp.stack([t["support"]["input_ids"] for t in batch_tasks])
        s_mask = jnp.stack([t["support"]["attention_mask"] for t in batch_tasks])
        s_lab = jnp.stack([t["support"]["labels"] for t in batch_tasks])
        q_ids = jnp.stack([t["query"]["input_ids"] for t in batch_tasks])
        q_mask = jnp.stack([t["query"]["attention_mask"] for t in batch_tasks])
        q_lab = jnp.stack([t["query"]["labels"] for t in batch_tasks])

        ns = s_ids.shape[1]
        bs = min(self.inner_batch_size, ns)
        n_batches = max(1, ns // bs)
        # TODO(synk): trailing partial support batch dropped (ns % bs rows unused).

        if training:
            self.adam_t += 1

        acc, loss, w_new, b_new, w_meta_new, m_new, v_new = self._forward(
            self.embedding, self.w_meta, self.adapter_w, self.adapter_b,
            self.adam_m, self.adam_v, jnp.float32(max(self.adam_t, 1)),
            s_ids, s_mask, s_lab, q_ids, q_mask, q_lab,
            n_iters=n_steps * n_batches, n_batches=n_batches, bs=bs,
            inner_lr=self.inner_update_lr, reg=self.reg_const,
            nlr=self.neumann_lr, hq=self.args.hessian_q,
            training=bool(training), outer_lr=self.outer_update_lr,
            eps=self.args.lambd)

        # adapter state carries across tasks and forward calls, as in PyTorch
        self.adapter_w, self.adapter_b = w_new, b_new
        if training:
            self.w_meta, self.adam_m, self.adam_v = w_meta_new, m_new, v_new
        return acc, loss


# --------------------------------- main -----------------------------------------

if __name__ == "__main__":
    class Args:
        pass

    args = Args()
    args.num_labels = 4
    args.hidden_size = 32
    args.vocab_size = 64
    args.inner_batch_size = 4
    args.outer_update_lr = 1e-3
    args.inner_update_lr = 1e-1
    args.inner_update_step = 3
    args.y_warm_start = 2
    args.hessian_q = 3
    args.lambd = 1e-8
    args.data = "synthetic"
    args.methods = "adambo"

    seq = 8
    n_support, n_query = 8, 8
    num_tasks = 2
    key = jax.random.PRNGKey(0)

    def make_split(k, n):
        k1, k2 = jax.random.split(k)
        return {
            "input_ids": jax.random.randint(k1, (n, seq), 0, args.vocab_size,
                                            dtype=jnp.int32),
            "attention_mask": jnp.ones((n, seq), jnp.int32),
            "labels": jax.random.randint(k2, (n,), 0, args.num_labels,
                                         dtype=jnp.int32),
        }

    batch_tasks = []
    for _ in range(num_tasks):
        key, ks, kq = jax.random.split(key, 3)
        batch_tasks.append({"support": make_split(ks, n_support),
                            "query": make_split(kq, n_query)})

    learner = Learner(args)
    acc, loss = learner.forward(batch_tasks, training=True, step=0, epoch=0)
    jax.block_until_ready((acc, loss))
    print("KERNEL_OK")
</pallas_src>

<mosaic_0001>
module attributes {stable_mosaic.version = 11 : i64} {
  func.func @_fused_task_kernel(%arg0: i32, %arg1: memref<1x8x32xf32, #tpu.memory_space<vmem>>, %arg2: memref<1x8x1xi32, #tpu.memory_space<vmem>>, %arg3: memref<1x8x32xf32, #tpu.memory_space<vmem>>, %arg4: memref<1x8x1xi32, #tpu.memory_space<vmem>>, %arg5: memref<32x32xf32, #tpu.memory_space<vmem>>, %arg6: memref<4x32xf32, #tpu.memory_space<vmem>>, %arg7: memref<1x4xf32, #tpu.memory_space<vmem>>, %arg8: memref<1x1xf32, #tpu.memory_space<smem>>, %arg9: memref<1x1xf32, #tpu.memory_space<smem>>, %arg10: memref<32x32xf32, #tpu.memory_space<vmem>>, %arg11: memref<4x32xf32, #tpu.memory_space<vmem>>, %arg12: memref<1x4xf32, #tpu.memory_space<vmem>>) attributes {dimension_semantics = [#tpu.dimension_semantics<arbitrary>], iteration_bounds = array<i64: 2>, scalar_prefetch = 0 : i64, scratch_operands = 0 : i64, tpu.core_type = #tpu.core_type<tc>, window_params = [{transform_indices = @transform_0, window_bounds = array<i64: 1, 8, 32>}, {transform_indices = @transform_1, window_bounds = array<i64: 1, 8, 1>}, {transform_indices = @transform_2, window_bounds = array<i64: 1, 8, 32>}, {transform_indices = @transform_3, window_bounds = array<i64: 1, 8, 1>}, {pipeline_mode = #tpu.pipeline_mode<synchronous>, transform_indices = @transform_4, window_bounds = array<i64: 32, 32>}, {pipeline_mode = #tpu.pipeline_mode<synchronous>, transform_indices = @transform_5, window_bounds = array<i64: 4, 32>}, {pipeline_mode = #tpu.pipeline_mode<synchronous>, transform_indices = @transform_6, window_bounds = array<i64: 1, 4>}, {transform_indices = @transform_7, window_bounds = array<i64: 1, 1>}, {transform_indices = @transform_8, window_bounds = array<i64: 1, 1>}, {pipeline_mode = #tpu.pipeline_mode<synchronous>, transform_indices = @transform_9, window_bounds = array<i64: 32, 32>}, {pipeline_mode = #tpu.pipeline_mode<synchronous>, transform_indices = @transform_10, window_bounds = array<i64: 4, 32>}, {pipeline_mode = #tpu.pipeline_mode<synchronous>, transform_indices = @transform_11, window_bounds = array<i64: 1, 4>}]} {
    %c0_i32 = arith.constant 0 : i32
    %0 = arith.cmpi eq, %arg0, %c0_i32 : i32
    %1 = arith.extui %0 : i1 to i32
    %c0_i32_0 = arith.constant 0 : i32
    %2 = arith.cmpi ne, %1, %c0_i32_0 : i32
    scf.if %2 {
      %c0_136 = arith.constant 0 : index
      %c0_137 = arith.constant 0 : index
      %366 = vector.load %arg6[%c0_136, %c0_137] : memref<4x32xf32, #tpu.memory_space<vmem>>, vector<4x32xf32>
      %c0_138 = arith.constant 0 : index
      %c0_139 = arith.constant 0 : index
      %367 = vector.load %arg11[%c0_138, %c0_139] : memref<4x32xf32, #tpu.memory_space<vmem>>, vector<4x32xf32>
      tpu.vector_store %arg11[%c0_138, %c0_139], %366 {strides = array<i32>} : memref<4x32xf32, #tpu.memory_space<vmem>>, vector<4x32xf32>,
      %c0_140 = arith.constant 0 : index
      %c0_141 = arith.constant 0 : index
      %368 = vector.load %arg7[%c0_140, %c0_141] : memref<1x4xf32, #tpu.memory_space<vmem>>, vector<1x4xf32>
      %c0_142 = arith.constant 0 : index
      %c0_143 = arith.constant 0 : index
      %369 = vector.load %arg12[%c0_142, %c0_143] : memref<1x4xf32, #tpu.memory_space<vmem>>, vector<1x4xf32>
      tpu.vector_store %arg12[%c0_142, %c0_143], %368 {strides = array<i32>} : memref<1x4xf32, #tpu.memory_space<vmem>>, vector<1x4xf32>,
      %cst_144 = arith.constant 0.000000e+00 : f32
      %370 = vector.broadcast %cst_144 : f32 to vector<32x32xf32>
      %c0_145 = arith.constant 0 : index
      %c0_146 = arith.constant 0 : index
      %371 = vector.load %arg10[%c0_145, %c0_146] : memref<32x32xf32, #tpu.memory_space<vmem>>, vector<32x32xf32>
      tpu.vector_store %arg10[%c0_145, %c0_146], %370 {strides = array<i32>} : memref<32x32xf32, #tpu.memory_space<vmem>>, vector<32x32xf32>,
      %cst_147 = arith.constant 0.000000e+00 : f32
      %c0_148 = arith.constant 0 : index
      %c0_149 = arith.constant 0 : index
      %372 = memref.load %arg8[%c0_148, %c0_149] : memref<1x1xf32, #tpu.memory_space<smem>>
      memref.store %cst_147, %arg8[%c0_148, %c0_149] : memref<1x1xf32, #tpu.memory_space<smem>>
      %cst_150 = arith.constant 0.000000e+00 : f32
      %c0_151 = arith.constant 0 : index
      %c0_152 = arith.constant 0 : index
      %373 = memref.load %arg9[%c0_151, %c0_152] : memref<1x1xf32, #tpu.memory_space<smem>>
      memref.store %cst_150, %arg9[%c0_151, %c0_152] : memref<1x1xf32, #tpu.memory_space<smem>>
    } else {
    }
    %c0 = arith.constant 0 : index
    %c0_1 = arith.constant 0 : index
    %3 = vector.load %arg5[%c0, %c0_1] : memref<32x32xf32, #tpu.memory_space<vmem>>, vector<32x32xf32>
    %c0_2 = arith.constant 0 : index
    %c0_3 = arith.constant 0 : index
    %c0_4 = arith.constant 0 : index
    %4 = vector.load %arg1[%c0_2, %c0_3, %c0_4] : memref<1x8x32xf32, #tpu.memory_space<vmem>>, vector<1x8x32xf32>
    %5 = vector.shape_cast %4 : vector<1x8x32xf32> to vector<8x32xf32>
    %c0_5 = arith.constant 0 : index
    %c0_6 = arith.constant 0 : index
    %c0_7 = arith.constant 0 : index
    %6 = vector.load %arg3[%c0_5, %c0_6, %c0_7] : memref<1x8x32xf32, #tpu.memory_space<vmem>>, vector<1x8x32xf32>
    %7 = vector.shape_cast %6 : vector<1x8x32xf32> to vector<8x32xf32>
    %c0_8 = arith.constant 0 : index
    %c0_9 = arith.constant 0 : index
    %c0_10 = arith.constant 0 : index
    %8 = vector.load %arg2[%c0_8, %c0_9, %c0_10] : memref<1x8x1xi32, #tpu.memory_space<vmem>>, vector<1x8x1xi32>
    %9 = vector.shape_cast %8 : vector<1x8x1xi32> to vector<8x1xi32>
    %c0_11 = arith.constant 0 : index
    %c0_12 = arith.constant 0 : index
    %c0_13 = arith.constant 0 : index
    %10 = vector.load %arg4[%c0_11, %c0_12, %c0_13] : memref<1x8x1xi32, #tpu.memory_space<vmem>>, vector<1x8x1xi32>
    %11 = vector.shape_cast %10 : vector<1x8x1xi32> to vector<8x1xi32>
    %12 = tpu.iota {dimensions = array<i32: 1>} : vector<8x4xi32>
    %13 = vector.broadcast %9 : vector<8x1xi32> to vector<8x4xi32>
    %14 = arith.cmpi eq, %13, %12 : vector<8x4xi32>
    %15 = arith.extui %14 : vector<8x4xi1> to vector<8x4xi32>
    %16 = arith.sitofp %15 : vector<8x4xi32> to vector<8x4xf32>
    %17 = tpu.iota {dimensions = array<i32: 1>} : vector<8x4xi32>
    %18 = vector.broadcast %11 : vector<8x1xi32> to vector<8x4xi32>
    %19 = arith.cmpi eq, %18, %17 : vector<8x4xi32>
    %20 = arith.extui %19 : vector<8x4xi1> to vector<8x4xi32>
    %21 = arith.sitofp %20 : vector<8x4xi32> to vector<8x4xf32>
    %cst = arith.constant dense<0.000000e+00> : vector<8x32xf32>
    %22 = tpu.matmul %5, %3, %cst {dimension_numbers = #tpu.dot_dimension_numbers<[1], [0], [0], [1], [0, 0, 1, 1], [], []>} : vector<8x32xf32>, vector<32x32xf32>, vector<8x32xf32> -> vector<8x32xf32>
    %cst_14 = arith.constant dense<0.000000e+00> : vector<8x32xf32>
    %23 = tpu.matmul %7, %3, %cst_14 {dimension_numbers = #tpu.dot_dimension_numbers<[1], [0], [0], [1], [0, 0, 1, 1], [], []>} : vector<8x32xf32>, vector<32x32xf32>, vector<8x32xf32> -> vector<8x32xf32>
    %24 = tpu.iota {dimensions = array<i32: 0>} : vector<8x1xi32>
    %c0_i32_15 = arith.constant 0 : i32
    %25 = vector.broadcast %c0_i32_15 : i32 to vector<8x1xi32>
    %26 = arith.cmpi sge, %24, %25 : vector<8x1xi32>
    %c4_i32 = arith.constant 4 : i32
    %27 = vector.broadcast %c4_i32 : i32 to vector<8x1xi32>
    %28 = arith.cmpi slt, %24, %27 : vector<8x1xi32>
    %29 = arith.andi %26, %28 : vector<8x1xi1>
    %30 = arith.extui %29 : vector<8x1xi1> to vector<8x1xi32>
    %31 = arith.sitofp %30 : vector<8x1xi32> to vector<8x1xf32>
    %c4_i32_16 = arith.constant 4 : i32
    %32 = vector.broadcast %c4_i32_16 : i32 to vector<8x1xi32>
    %33 = arith.cmpi sge, %24, %32 : vector<8x1xi32>
    %c8_i32 = arith.constant 8 : i32
    %34 = vector.broadcast %c8_i32 : i32 to vector<8x1xi32>
    %35 = arith.cmpi slt, %24, %34 : vector<8x1xi32>
    %36 = arith.andi %33, %35 : vector<8x1xi1>
    %37 = arith.extui %36 : vector<8x1xi1> to vector<8x1xi32>
    %38 = arith.sitofp %37 : vector<8x1xi32> to vector<8x1xf32>
    %c0_17 = arith.constant 0 : index
    %c0_18 = arith.constant 0 : index
    %39 = vector.load %arg11[%c0_17, %c0_18] : memref<4x32xf32, #tpu.memory_space<vmem>>, vector<4x32xf32>
    %c0_19 = arith.constant 0 : index
    %c0_20 = arith.constant 0 : index
    %40 = vector.load %arg12[%c0_19, %c0_20] : memref<1x4xf32, #tpu.memory_space<vmem>>, vector<1x4xf32>
    %cst_21 = arith.constant dense<0.000000e+00> : vector<8x4xf32>
    %41 = tpu.matmul %22, %39, %cst_21 {dimension_numbers = #tpu.dot_dimension_numbers<[1], [1], [0], [0], [0, 0, 1, 0], [], []>} : vector<8x32xf32>, vector<4x32xf32>, vector<8x4xf32> -> vector<8x4xf32>
    %42 = vector.broadcast %40 : vector<1x4xf32> to vector<8x4xf32>
    %43 = arith.addf %41, %42 : vector<8x4xf32>
    %cst_22 = arith.constant dense<0xFF800000> : vector<8xf32>
    %44 = vector.multi_reduction <maximumf>, %43, %cst_22 [1] : vector<8x4xf32> to vector<8xf32>
    %45 = vector.shape_cast %44 : vector<8xf32> to vector<8x1xf32>
    %46 = vector.broadcast %45 : vector<8x1xf32> to vector<8x4xf32>
    %47 = arith.subf %43, %46 : vector<8x4xf32>
    %48 = math.exp %47 : vector<8x4xf32>
    %cst_23 = arith.constant dense<0.000000e+00> : vector<8xf32>
    %49 = vector.multi_reduction <add>, %48, %cst_23 [1] : vector<8x4xf32> to vector<8xf32>
    %50 = vector.shape_cast %49 : vector<8xf32> to vector<8x1xf32>
    %51 = tpu.reciprocal %50 {approx = true} : vector<8x1xf32> -> vector<8x1xf32>
    %52 = vector.broadcast %51 : vector<8x1xf32> to vector<8x4xf32>
    %53 = arith.mulf %48, %52 : vector<8x4xf32>
    %54 = arith.subf %53, %16 : vector<8x4xf32>
    %55 = vector.broadcast %31 : vector<8x1xf32> to vector<8x4xf32>
    %56 = arith.mulf %55, %54 : vector<8x4xf32>
    %cst_24 = arith.constant 2.500000e-01 : f32
    %57 = vector.broadcast %cst_24 : f32 to vector<8x4xf32>
    %58 = arith.mulf %56, %57 : vector<8x4xf32>
    %cst_25 = arith.constant dense<0.000000e+00> : vector<4x32xf32>
    %59 = tpu.matmul %58, %22, %cst_25 {dimension_numbers = #tpu.dot_dimension_numbers<[0], [0], [1], [1], [0, 1, 1, 1], [], []>} : vector<8x4xf32>, vector<8x32xf32>, vector<4x32xf32> -> vector<4x32xf32>
    %cst_26 = arith.constant 2.000000e-04 : f32
    %60 = vector.broadcast %cst_26 : f32 to vector<4x32xf32>
    %61 = arith.mulf %60, %39 : vector<4x32xf32>
    %62 = arith.addf %59, %61 : vector<4x32xf32>
    %cst_27 = arith.constant dense<0.000000e+00> : vector<4xf32>
    %63 = vector.multi_reduction <add>, %58, %cst_27 [0] : vector<8x4xf32> to vector<4xf32>
    %64 = vector.shape_cast %63 : vector<4xf32> to vector<1x4xf32>
    %cst_28 = arith.constant 2.000000e-04 : f32
    %65 = vector.broadcast %cst_28 : f32 to vector<1x4xf32>
    %66 = arith.mulf %65, %40 : vector<1x4xf32>
    %67 = arith.addf %64, %66 : vector<1x4xf32>
    %cst_29 = arith.constant 1.000000e-01 : f32
    %68 = vector.broadcast %cst_29 : f32 to vector<4x32xf32>
    %69 = arith.mulf %68, %62 : vector<4x32xf32>
    %70 = arith.subf %39, %69 : vector<4x32xf32>
    %cst_30 = arith.constant 1.000000e-01 : f32
    %71 = vector.broadcast %cst_30 : f32 to vector<1x4xf32>
    %72 = arith.mulf %71, %67 : vector<1x4xf32>
    %73 = arith.subf %40, %72 : vector<1x4xf32>
    %cst_31 = arith.constant dense<0.000000e+00> : vector<8x4xf32>
    %74 = tpu.matmul %22, %70, %cst_31 {dimension_numbers = #tpu.dot_dimension_numbers<[1], [1], [0], [0], [0, 0, 1, 0], [], []>} : vector<8x32xf32>, vector<4x32xf32>, vector<8x4xf32> -> vector<8x4xf32>
    %75 = vector.broadcast %73 : vector<1x4xf32> to vector<8x4xf32>
    %76 = arith.addf %74, %75 : vector<8x4xf32>
    %cst_32 = arith.constant dense<0xFF800000> : vector<8xf32>
    %77 = vector.multi_reduction <maximumf>, %76, %cst_32 [1] : vector<8x4xf32> to vector<8xf32>
    %78 = vector.shape_cast %77 : vector<8xf32> to vector<8x1xf32>
    %79 = vector.broadcast %78 : vector<8x1xf32> to vector<8x4xf32>
    %80 = arith.subf %76, %79 : vector<8x4xf32>
    %81 = math.exp %80 : vector<8x4xf32>
    %cst_33 = arith.constant dense<0.000000e+00> : vector<8xf32>
    %82 = vector.multi_reduction <add>, %81, %cst_33 [1] : vector<8x4xf32> to vector<8xf32>
    %83 = vector.shape_cast %82 : vector<8xf32> to vector<8x1xf32>
    %84 = tpu.reciprocal %83 {approx = true} : vector<8x1xf32> -> vector<8x1xf32>
    %85 = vector.broadcast %84 : vector<8x1xf32> to vector<8x4xf32>
    %86 = arith.mulf %81, %85 : vector<8x4xf32>
    %87 = arith.subf %86, %16 : vector<8x4xf32>
    %88 = vector.broadcast %38 : vector<8x1xf32> to vector<8x4xf32>
    %89 = arith.mulf %88, %87 : vector<8x4xf32>
    %cst_34 = arith.constant 2.500000e-01 : f32
    %90 = vector.broadcast %cst_34 : f32 to vector<8x4xf32>
    %91 = arith.mulf %89, %90 : vector<8x4xf32>
    %cst_35 = arith.constant dense<0.000000e+00> : vector<4x32xf32>
    %92 = tpu.matmul %91, %22, %cst_35 {dimension_numbers = #tpu.dot_dimension_numbers<[0], [0], [1], [1], [0, 1, 1, 1], [], []>} : vector<8x4xf32>, vector<8x32xf32>, vector<4x32xf32> -> vector<4x32xf32>
    %cst_36 = arith.constant 2.000000e-04 : f32
    %93 = vector.broadcast %cst_36 : f32 to vector<4x32xf32>
    %94 = arith.mulf %93, %70 : vector<4x32xf32>
    %95 = arith.addf %92, %94 : vector<4x32xf32>
    %cst_37 = arith.constant dense<0.000000e+00> : vector<4xf32>
    %96 = vector.multi_reduction <add>, %91, %cst_37 [0] : vector<8x4xf32> to vector<4xf32>
    %97 = vector.shape_cast %96 : vector<4xf32> to vector<1x4xf32>
    %cst_38 = arith.constant 2.000000e-04 : f32
    %98 = vector.broadcast %cst_38 : f32 to vector<1x4xf32>
    %99 = arith.mulf %98, %73 : vector<1x4xf32>
    %100 = arith.addf %97, %99 : vector<1x4xf32>
    %cst_39 = arith.constant 1.000000e-01 : f32
    %101 = vector.broadcast %cst_39 : f32 to vector<4x32xf32>
    %102 = arith.mulf %101, %95 : vector<4x32xf32>
    %103 = arith.subf %70, %102 : vector<4x32xf32>
    %cst_40 = arith.constant 1.000000e-01 : f32
    %104 = vector.broadcast %cst_40 : f32 to vector<1x4xf32>
    %105 = arith.mulf %104, %100 : vector<1x4xf32>
    %106 = arith.subf %73, %105 : vector<1x4xf32>
    %cst_41 = arith.constant dense<0.000000e+00> : vector<8x4xf32>
    %107 = tpu.matmul %22, %103, %cst_41 {dimension_numbers = #tpu.dot_dimension_numbers<[1], [1], [0], [0], [0, 0, 1, 0], [], []>} : vector<8x32xf32>, vector<4x32xf32>, vector<8x4xf32> -> vector<8x4xf32>
    %108 = vector.broadcast %106 : vector<1x4xf32> to vector<8x4xf32>
    %109 = arith.addf %107, %108 : vector<8x4xf32>
    %cst_42 = arith.constant dense<0xFF800000> : vector<8xf32>
    %110 = vector.multi_reduction <maximumf>, %109, %cst_42 [1] : vector<8x4xf32> to vector<8xf32>
    %111 = vector.shape_cast %110 : vector<8xf32> to vector<8x1xf32>
    %112 = vector.broadcast %111 : vector<8x1xf32> to vector<8x4xf32>
    %113 = arith.subf %109, %112 : vector<8x4xf32>
    %114 = math.exp %113 : vector<8x4xf32>
    %cst_43 = arith.constant dense<0.000000e+00> : vector<8xf32>
    %115 = vector.multi_reduction <add>, %114, %cst_43 [1] : vector<8x4xf32> to vector<8xf32>
    %116 = vector.shape_cast %115 : vector<8xf32> to vector<8x1xf32>
    %117 = tpu.reciprocal %116 {approx = true} : vector<8x1xf32> -> vector<8x1xf32>
    %118 = vector.broadcast %117 : vector<8x1xf32> to vector<8x4xf32>
    %119 = arith.mulf %114, %118 : vector<8x4xf32>
    %120 = arith.subf %119, %16 : vector<8x4xf32>
    %121 = vector.broadcast %31 : vector<8x1xf32> to vector<8x4xf32>
    %122 = arith.mulf %121, %120 : vector<8x4xf32>
    %cst_44 = arith.constant 2.500000e-01 : f32
    %123 = vector.broadcast %cst_44 : f32 to vector<8x4xf32>
    %124 = arith.mulf %122, %123 : vector<8x4xf32>
    %cst_45 = arith.constant dense<0.000000e+00> : vector<4x32xf32>
    %125 = tpu.matmul %124, %22, %cst_45 {dimension_numbers = #tpu.dot_dimension_numbers<[0], [0], [1], [1], [0, 1, 1, 1], [], []>} : vector<8x4xf32>, vector<8x32xf32>, vector<4x32xf32> -> vector<4x32xf32>
    %cst_46 = arith.constant 2.000000e-04 : f32
    %126 = vector.broadcast %cst_46 : f32 to vector<4x32xf32>
    %127 = arith.mulf %126, %103 : vector<4x32xf32>
    %128 = arith.addf %125, %127 : vector<4x32xf32>
    %cst_47 = arith.constant dense<0.000000e+00> : vector<4xf32>
    %129 = vector.multi_reduction <add>, %124, %cst_47 [0] : vector<8x4xf32> to vector<4xf32>
    %130 = vector.shape_cast %129 : vector<4xf32> to vector<1x4xf32>
    %cst_48 = arith.constant 2.000000e-04 : f32
    %131 = vector.broadcast %cst_48 : f32 to vector<1x4xf32>
    %132 = arith.mulf %131, %106 : vector<1x4xf32>
    %133 = arith.addf %130, %132 : vector<1x4xf32>
    %cst_49 = arith.constant 1.000000e-01 : f32
    %134 = vector.broadcast %cst_49 : f32 to vector<4x32xf32>
    %135 = arith.mulf %134, %128 : vector<4x32xf32>
    %136 = arith.subf %103, %135 : vector<4x32xf32>
    %cst_50 = arith.constant 1.000000e-01 : f32
    %137 = vector.broadcast %cst_50 : f32 to vector<1x4xf32>
    %138 = arith.mulf %137, %133 : vector<1x4xf32>
    %139 = arith.subf %106, %138 : vector<1x4xf32>
    %cst_51 = arith.constant dense<0.000000e+00> : vector<8x4xf32>
    %140 = tpu.matmul %22, %136, %cst_51 {dimension_numbers = #tpu.dot_dimension_numbers<[1], [1], [0], [0], [0, 0, 1, 0], [], []>} : vector<8x32xf32>, vector<4x32xf32>, vector<8x4xf32> -> vector<8x4xf32>
    %141 = vector.broadcast %139 : vector<1x4xf32> to vector<8x4xf32>
    %142 = arith.addf %140, %141 : vector<8x4xf32>
    %cst_52 = arith.constant dense<0xFF800000> : vector<8xf32>
    %143 = vector.multi_reduction <maximumf>, %142, %cst_52 [1] : vector<8x4xf32> to vector<8xf32>
    %144 = vector.shape_cast %143 : vector<8xf32> to vector<8x1xf32>
    %145 = vector.broadcast %144 : vector<8x1xf32> to vector<8x4xf32>
    %146 = arith.subf %142, %145 : vector<8x4xf32>
    %147 = math.exp %146 : vector<8x4xf32>
    %cst_53 = arith.constant dense<0.000000e+00> : vector<8xf32>
    %148 = vector.multi_reduction <add>, %147, %cst_53 [1] : vector<8x4xf32> to vector<8xf32>
    %149 = vector.shape_cast %148 : vector<8xf32> to vector<8x1xf32>
    %150 = tpu.reciprocal %149 {approx = true} : vector<8x1xf32> -> vector<8x1xf32>
    %151 = vector.broadcast %150 : vector<8x1xf32> to vector<8x4xf32>
    %152 = arith.mulf %147, %151 : vector<8x4xf32>
    %153 = arith.subf %152, %16 : vector<8x4xf32>
    %154 = vector.broadcast %38 : vector<8x1xf32> to vector<8x4xf32>
    %155 = arith.mulf %154, %153 : vector<8x4xf32>
    %cst_54 = arith.constant 2.500000e-01 : f32
    %156 = vector.broadcast %cst_54 : f32 to vector<8x4xf32>
    %157 = arith.mulf %155, %156 : vector<8x4xf32>
    %cst_55 = arith.constant dense<0.000000e+00> : vector<4x32xf32>
    %158 = tpu.matmul %157, %22, %cst_55 {dimension_numbers = #tpu.dot_dimension_numbers<[0], [0], [1], [1], [0, 1, 1, 1], [], []>} : vector<8x4xf32>, vector<8x32xf32>, vector<4x32xf32> -> vector<4x32xf32>
    %cst_56 = arith.constant 2.000000e-04 : f32
    %159 = vector.broadcast %cst_56 : f32 to vector<4x32xf32>
    %160 = arith.mulf %159, %136 : vector<4x32xf32>
    %161 = arith.addf %158, %160 : vector<4x32xf32>
    %cst_57 = arith.constant dense<0.000000e+00> : vector<4xf32>
    %162 = vector.multi_reduction <add>, %157, %cst_57 [0] : vector<8x4xf32> to vector<4xf32>
    %163 = vector.shape_cast %162 : vector<4xf32> to vector<1x4xf32>
    %cst_58 = arith.constant 2.000000e-04 : f32
    %164 = vector.broadcast %cst_58 : f32 to vector<1x4xf32>
    %165 = arith.mulf %164, %139 : vector<1x4xf32>
    %166 = arith.addf %163, %165 : vector<1x4xf32>
    %cst_59 = arith.constant 1.000000e-01 : f32
    %167 = vector.broadcast %cst_59 : f32 to vector<4x32xf32>
    %168 = arith.mulf %167, %161 : vector<4x32xf32>
    %169 = arith.subf %136, %168 : vector<4x32xf32>
    %cst_60 = arith.constant 1.000000e-01 : f32
    %170 = vector.broadcast %cst_60 : f32 to vector<1x4xf32>
    %171 = arith.mulf %170, %166 : vector<1x4xf32>
    %172 = arith.subf %139, %171 : vector<1x4xf32>
    %c0_61 = arith.constant 0 : index
    %c0_62 = arith.constant 0 : index
    %173 = vector.load %arg11[%c0_61, %c0_62] : memref<4x32xf32, #tpu.memory_space<vmem>>, vector<4x32xf32>
    tpu.vector_store %arg11[%c0_61, %c0_62], %169 {strides = array<i32>} : memref<4x32xf32, #tpu.memory_space<vmem>>, vector<4x32xf32>,
    %c0_63 = arith.constant 0 : index
    %c0_64 = arith.constant 0 : index
    %174 = vector.load %arg12[%c0_63, %c0_64] : memref<1x4xf32, #tpu.memory_space<vmem>>, vector<1x4xf32>
    tpu.vector_store %arg12[%c0_63, %c0_64], %172 {strides = array<i32>} : memref<1x4xf32, #tpu.memory_space<vmem>>, vector<1x4xf32>,
    %cst_65 = arith.constant dense<0.000000e+00> : vector<8x4xf32>
    %175 = tpu.matmul %23, %169, %cst_65 {dimension_numbers = #tpu.dot_dimension_numbers<[1], [1], [0], [0], [0, 0, 1, 0], [], []>} : vector<8x32xf32>, vector<4x32xf32>, vector<8x4xf32> -> vector<8x4xf32>
    %176 = vector.broadcast %172 : vector<1x4xf32> to vector<8x4xf32>
    %177 = arith.addf %175, %176 : vector<8x4xf32>
    %cst_66 = arith.constant dense<0xFF800000> : vector<8xf32>
    %178 = vector.multi_reduction <maximumf>, %177, %cst_66 [1] : vector<8x4xf32> to vector<8xf32>
    %179 = vector.shape_cast %178 : vector<8xf32> to vector<8x1xf32>
    %180 = vector.broadcast %179 : vector<8x1xf32> to vector<8x4xf32>
    %181 = arith.subf %177, %180 : vector<8x4xf32>
    %182 = math.exp %181 : vector<8x4xf32>
    %cst_67 = arith.constant dense<0.000000e+00> : vector<8xf32>
    %183 = vector.multi_reduction <add>, %182, %cst_67 [1] : vector<8x4xf32> to vector<8xf32>
    %184 = vector.shape_cast %183 : vector<8xf32> to vector<8x1xf32>
    %185 = tpu.reciprocal %184 {approx = true} : vector<8x1xf32> -> vector<8x1xf32>
    %186 = vector.broadcast %185 : vector<8x1xf32> to vector<8x4xf32>
    %187 = arith.mulf %182, %186 : vector<8x4xf32>
    %188 = vector.broadcast %179 : vector<8x1xf32> to vector<8x4xf32>
    %189 = arith.subf %177, %188 : vector<8x4xf32>
    %190 = math.log %184 : vector<8x1xf32>
    %191 = vector.broadcast %190 : vector<8x1xf32> to vector<8x4xf32>
    %192 = arith.subf %189, %191 : vector<8x4xf32>
    %193 = arith.mulf %21, %192 : vector<8x4xf32>
    %194 = vector.shape_cast %193 : vector<8x4xf32> to vector<1x8x4xf32>
    %cst_68 = arith.constant dense<0.000000e+00> : vector<1xf32>
    %195 = vector.multi_reduction <add>, %194, %cst_68 [1, 2] : vector<1x8x4xf32> to vector<1xf32>
    %196 = vector.shape_cast %195 : vector<1xf32> to vector<1x1x1xf32>
    %197 = vector.extract %196[0, 0, 0] : f32 from vector<1x1x1xf32>
    %cst_69 = arith.constant 0.000000e+00 : f32
    %198 = arith.subf %cst_69, %197 : f32
    %cst_70 = arith.constant 1.250000e-01 : f32
    %199 = arith.mulf %198, %cst_70 : f32
    %c0_71 = arith.constant 0 : index
    %c0_72 = arith.constant 0 : index
    %200 = memref.load %arg8[%c0_71, %c0_72] : memref<1x1xf32, #tpu.memory_space<smem>>
    %cst_73 = arith.constant 5.000000e-01 : f32
    %201 = arith.mulf %199, %cst_73 : f32
    %202 = arith.addf %200, %201 : f32
    %c0_74 = arith.constant 0 : index
    %c0_75 = arith.constant 0 : index
    %203 = memref.load %arg8[%c0_74, %c0_75] : memref<1x1xf32, #tpu.memory_space<smem>>
    memref.store %202, %arg8[%c0_74, %c0_75] : memref<1x1xf32, #tpu.memory_space<smem>>
    %204 = tpu.iota {dimensions = array<i32: 1>} : vector<8x4xi32>
    %205 = arith.sitofp %204 : vector<8x4xi32> to vector<8x4xf32>
    %cst_76 = arith.constant dense<0xFF800000> : vector<8xf32>
    %206 = vector.multi_reduction <maximumf>, %187, %cst_76 [1] : vector<8x4xf32> to vector<8xf32>
    %207 = vector.shape_cast %206 : vector<8xf32> to vector<8x1xf32>
    %208 = vector.broadcast %207 : vector<8x1xf32> to vector<8x4xf32>
    %209 = arith.cmpf oge, %187, %208 : vector<8x4xf32>
    %cst_77 = arith.constant 4.000000e+00 : f32
    %210 = vector.broadcast %cst_77 : f32 to vector<8x4xf32>
    %211 = arith.select %209, %205, %210 : vector<8x4xi1>, vector<8x4xf32>
    %cst_78 = arith.constant dense<0x7F800000> : vector<8xf32>
    %212 = vector.multi_reduction <minimumf>, %211, %cst_78 [1] : vector<8x4xf32> to vector<8xf32>
    %213 = vector.shape_cast %212 : vector<8xf32> to vector<8x1xf32>
    %214 = arith.sitofp %11 : vector<8x1xi32> to vector<8x1xf32>
    %215 = arith.cmpf oeq, %213, %214 : vector<8x1xf32>
    %216 = arith.extui %215 : vector<8x1xi1> to vector<8x1xi32>
    %217 = arith.sitofp %216 : vector<8x1xi32> to vector<8x1xf32>
    %c0_79 = arith.constant 0 : index
    %c0_80 = arith.constant 0 : index
    %218 = memref.load %arg9[%c0_79, %c0_80] : memref<1x1xf32, #tpu.memory_space<smem>>
    %219 = vector.shape_cast %217 : vector<8x1xf32> to vector<1x8x1xf32>
    %cst_81 = arith.constant dense<0.000000e+00> : vector<1xf32>
    %220 = vector.multi_reduction <add>, %219, %cst_81 [1, 2] : vector<1x8x1xf32> to vector<1xf32>
    %221 = vector.shape_cast %220 : vector<1xf32> to vector<1x1x1xf32>
    %222 = vector.extract %221[0, 0, 0] : f32 from vector<1x1x1xf32>
    %cst_82 = arith.constant 1.250000e-01 : f32
    %223 = arith.mulf %222, %cst_82 : f32
    %cst_83 = arith.constant 5.000000e-01 : f32
    %224 = arith.mulf %223, %cst_83 : f32
    %225 = arith.addf %218, %224 : f32
    %c0_84 = arith.constant 0 : index
    %c0_85 = arith.constant 0 : index
    %226 = memref.load %arg9[%c0_84, %c0_85] : memref<1x1xf32, #tpu.memory_space<smem>>
    memref.store %225, %arg9[%c0_84, %c0_85] : memref<1x1xf32, #tpu.memory_space<smem>>
    %227 = arith.subf %187, %21 : vector<8x4xf32>
    %cst_86 = arith.constant 1.250000e-01 : f32
    %228 = vector.broadcast %cst_86 : f32 to vector<8x4xf32>
    %229 = arith.mulf %227, %228 : vector<8x4xf32>
    %230 = vector.extract_strided_slice %22 {offsets = [4, 0], sizes = [4, 32], strides = [1, 1]} : vector<8x32xf32> to vector<4x32xf32>
    %cst_87 = arith.constant dense<0.000000e+00> : vector<4x4xf32>
    %231 = tpu.matmul %230, %169, %cst_87 {dimension_numbers = #tpu.dot_dimension_numbers<[1], [1], [0], [0], [0, 0, 1, 0], [], []>} : vector<4x32xf32>, vector<4x32xf32>, vector<4x4xf32> -> vector<4x4xf32>
    %232 = vector.broadcast %172 : vector<1x4xf32> to vector<4x4xf32>
    %233 = arith.addf %231, %232 : vector<4x4xf32>
    %cst_88 = arith.constant dense<0xFF800000> : vector<4xf32>
    %234 = vector.multi_reduction <maximumf>, %233, %cst_88 [1] : vector<4x4xf32> to vector<4xf32>
    %235 = vector.shape_cast %234 : vector<4xf32> to vector<4x1xf32>
    %236 = vector.broadcast %235 : vector<4x1xf32> to vector<4x4xf32>
    %237 = arith.subf %233, %236 : vector<4x4xf32>
    %238 = math.exp %237 : vector<4x4xf32>
    %cst_89 = arith.constant dense<0.000000e+00> : vector<4xf32>
    %239 = vector.multi_reduction <add>, %238, %cst_89 [1] : vector<4x4xf32> to vector<4xf32>
    %240 = vector.shape_cast %239 : vector<4xf32> to vector<4x1xf32>
    %241 = tpu.reciprocal %240 {approx = true} : vector<4x1xf32> -> vector<4x1xf32>
    %242 = vector.broadcast %241 : vector<4x1xf32> to vector<4x4xf32>
    %243 = arith.mulf %238, %242 : vector<4x4xf32>
    %cst_90 = arith.constant dense<0.000000e+00> : vector<4x32xf32>
    %244 = tpu.matmul %229, %23, %cst_90 {dimension_numbers = #tpu.dot_dimension_numbers<[0], [0], [1], [1], [0, 1, 1, 1], [], []>} : vector<8x4xf32>, vector<8x32xf32>, vector<4x32xf32> -> vector<4x32xf32>
    %cst_91 = arith.constant dense<0.000000e+00> : vector<4xf32>
    %245 = vector.multi_reduction <add>, %229, %cst_91 [0] : vector<8x4xf32> to vector<4xf32>
    %246 = vector.shape_cast %245 : vector<4xf32> to vector<1x4xf32>
    %cst_92 = arith.constant dense<0.000000e+00> : vector<8x32xf32>
    %247 = tpu.matmul %229, %169, %cst_92 {dimension_numbers = #tpu.dot_dimension_numbers<[1], [0], [0], [1], [0, 0, 1, 1], [], []>} : vector<8x4xf32>, vector<4x32xf32>, vector<8x32xf32> -> vector<8x32xf32>
    %cst_93 = arith.constant dense<0.000000e+00> : vector<32x32xf32>
    %248 = tpu.matmul %7, %247, %cst_93 {dimension_numbers = #tpu.dot_dimension_numbers<[0], [0], [1], [1], [0, 1, 1, 1], [], []>} : vector<8x32xf32>, vector<8x32xf32>, vector<32x32xf32> -> vector<32x32xf32>
    %cst_94 = arith.constant 0.000000e+00 : f32
    %249 = vector.broadcast %cst_94 : f32 to vector<4x32xf32>
    %cst_95 = arith.constant 0.000000e+00 : f32
    %250 = vector.broadcast %cst_95 : f32 to vector<1x4xf32>
    %cst_96 = arith.constant dense<0.000000e+00> : vector<4x4xf32>
    %251 = tpu.matmul %230, %244, %cst_96 {dimension_numbers = #tpu.dot_dimension_numbers<[1], [1], [0], [0], [0, 0, 1, 0], [], []>} : vector<4x32xf32>, vector<4x32xf32>, vector<4x4xf32> -> vector<4x4xf32>
    %252 = vector.broadcast %246 : vector<1x4xf32> to vector<4x4xf32>
    %253 = arith.addf %251, %252 : vector<4x4xf32>
    %254 = arith.mulf %243, %253 : vector<4x4xf32>
    %255 = arith.mulf %243, %253 : vector<4x4xf32>
    %cst_97 = arith.constant dense<0.000000e+00> : vector<4xf32>
    %256 = vector.multi_reduction <add>, %255, %cst_97 [1] : vector<4x4xf32> to vector<4xf32>
    %257 = vector.shape_cast %256 : vector<4xf32> to vector<4x1xf32>
    %258 = vector.broadcast %257 : vector<4x1xf32> to vector<4x4xf32>
    %259 = arith.mulf %243, %258 : vector<4x4xf32>
    %260 = arith.subf %254, %259 : vector<4x4xf32>
    %cst_98 = arith.constant 2.500000e-01 : f32
    %261 = vector.broadcast %cst_98 : f32 to vector<4x4xf32>
    %262 = arith.mulf %260, %261 : vector<4x4xf32>
    %cst_99 = arith.constant dense<0.000000e+00> : vector<4x32xf32>
    %263 = tpu.matmul %262, %230, %cst_99 {dimension_numbers = #tpu.dot_dimension_numbers<[0], [0], [1], [1], [0, 1, 1, 1], [], []>} : vector<4x4xf32>, vector<4x32xf32>, vector<4x32xf32> -> vector<4x32xf32>
    %cst_100 = arith.constant 2.000000e-04 : f32
    %264 = vector.broadcast %cst_100 : f32 to vector<4x32xf32>
    %265 = arith.mulf %264, %244 : vector<4x32xf32>
    %266 = arith.addf %263, %265 : vector<4x32xf32>
    %cst_101 = arith.constant dense<0.000000e+00> : vector<4xf32>
    %267 = vector.multi_reduction <add>, %262, %cst_101 [0] : vector<4x4xf32> to vector<4xf32>
    %268 = vector.shape_cast %267 : vector<4xf32> to vector<1x4xf32>
    %cst_102 = arith.constant 2.000000e-04 : f32
    %269 = vector.broadcast %cst_102 : f32 to vector<1x4xf32>
    %270 = arith.mulf %269, %246 : vector<1x4xf32>
    %271 = arith.addf %268, %270 : vector<1x4xf32>
    %cst_103 = arith.constant 9.99999974E-5 : f32
    %272 = vector.broadcast %cst_103 : f32 to vector<4x32xf32>
    %273 = arith.mulf %272, %266 : vector<4x32xf32>
    %274 = arith.subf %244, %273 : vector<4x32xf32>
    %cst_104 = arith.constant 9.99999974E-5 : f32
    %275 = vector.broadcast %cst_104 : f32 to vector<1x4xf32>
    %276 = arith.mulf %275, %271 : vector<1x4xf32>
    %277 = arith.subf %246, %276 : vector<1x4xf32>
    %278 = arith.addf %249, %274 : vector<4x32xf32>
    %279 = arith.addf %250, %277 : vector<1x4xf32>
    %cst_105 = arith.constant dense<0.000000e+00> : vector<4x4xf32>
    %280 = tpu.matmul %230, %274, %cst_105 {dimension_numbers = #tpu.dot_dimension_numbers<[1], [1], [0], [0], [0, 0, 1, 0], [], []>} : vector<4x32xf32>, vector<4x32xf32>, vector<4x4xf32> -> vector<4x4xf32>
    %281 = vector.broadcast %277 : vector<1x4xf32> to vector<4x4xf32>
    %282 = arith.addf %280, %281 : vector<4x4xf32>
    %283 = arith.mulf %243, %282 : vector<4x4xf32>
    %284 = arith.mulf %243, %282 : vector<4x4xf32>
    %cst_106 = arith.constant dense<0.000000e+00> : vector<4xf32>
    %285 = vector.multi_reduction <add>, %284, %cst_106 [1] : vector<4x4xf32> to vector<4xf32>
    %286 = vector.shape_cast %285 : vector<4xf32> to vector<4x1xf32>
    %287 = vector.broadcast %286 : vector<4x1xf32> to vector<4x4xf32>
    %288 = arith.mulf %243, %287 : vector<4x4xf32>
    %289 = arith.subf %283, %288 : vector<4x4xf32>
    %cst_107 = arith.constant 2.500000e-01 : f32
    %290 = vector.broadcast %cst_107 : f32 to vector<4x4xf32>
    %291 = arith.mulf %289, %290 : vector<4x4xf32>
    %cst_108 = arith.constant dense<0.000000e+00> : vector<4x32xf32>
    %292 = tpu.matmul %291, %230, %cst_108 {dimension_numbers = #tpu.dot_dimension_numbers<[0], [0], [1], [1], [0, 1, 1, 1], [], []>} : vector<4x4xf32>, vector<4x32xf32>, vector<4x32xf32> -> vector<4x32xf32>
    %cst_109 = arith.constant 2.000000e-04 : f32
    %293 = vector.broadcast %cst_109 : f32 to vector<4x32xf32>
    %294 = arith.mulf %293, %274 : vector<4x32xf32>
    %295 = arith.addf %292, %294 : vector<4x32xf32>
    %cst_110 = arith.constant dense<0.000000e+00> : vector<4xf32>
    %296 = vector.multi_reduction <add>, %291, %cst_110 [0] : vector<4x4xf32> to vector<4xf32>
    %297 = vector.shape_cast %296 : vector<4xf32> to vector<1x4xf32>
    %cst_111 = arith.constant 2.000000e-04 : f32
    %298 = vector.broadcast %cst_111 : f32 to vector<1x4xf32>
    %299 = arith.mulf %298, %277 : vector<1x4xf32>
    %300 = arith.addf %297, %299 : vector<1x4xf32>
    %cst_112 = arith.constant 9.99999974E-5 : f32
    %301 = vector.broadcast %cst_112 : f32 to vector<4x32xf32>
    %302 = arith.mulf %301, %295 : vector<4x32xf32>
    %303 = arith.subf %274, %302 : vector<4x32xf32>
    %cst_113 = arith.constant 9.99999974E-5 : f32
    %304 = vector.broadcast %cst_113 : f32 to vector<1x4xf32>
    %305 = arith.mulf %304, %300 : vector<1x4xf32>
    %306 = arith.subf %277, %305 : vector<1x4xf32>
    %307 = arith.addf %278, %303 : vector<4x32xf32>
    %308 = arith.addf %279, %306 : vector<1x4xf32>
    %cst_114 = arith.constant dense<0.000000e+00> : vector<4x4xf32>
    %309 = tpu.matmul %230, %303, %cst_114 {dimension_numbers = #tpu.dot_dimension_numbers<[1], [1], [0], [0], [0, 0, 1, 0], [], []>} : vector<4x32xf32>, vector<4x32xf32>, vector<4x4xf32> -> vector<4x4xf32>
    %310 = vector.broadcast %306 : vector<1x4xf32> to vector<4x4xf32>
    %311 = arith.addf %309, %310 : vector<4x4xf32>
    %312 = arith.mulf %243, %311 : vector<4x4xf32>
    %313 = arith.mulf %243, %311 : vector<4x4xf32>
    %cst_115 = arith.constant dense<0.000000e+00> : vector<4xf32>
    %314 = vector.multi_reduction <add>, %313, %cst_115 [1] : vector<4x4xf32> to vector<4xf32>
    %315 = vector.shape_cast %314 : vector<4xf32> to vector<4x1xf32>
    %316 = vector.broadcast %315 : vector<4x1xf32> to vector<4x4xf32>
    %317 = arith.mulf %243, %316 : vector<4x4xf32>
    %318 = arith.subf %312, %317 : vector<4x4xf32>
    %cst_116 = arith.constant 2.500000e-01 : f32
    %319 = vector.broadcast %cst_116 : f32 to vector<4x4xf32>
    %320 = arith.mulf %318, %319 : vector<4x4xf32>
    %cst_117 = arith.constant dense<0.000000e+00> : vector<4x32xf32>
    %321 = tpu.matmul %320, %230, %cst_117 {dimension_numbers = #tpu.dot_dimension_numbers<[0], [0], [1], [1], [0, 1, 1, 1], [], []>} : vector<4x4xf32>, vector<4x32xf32>, vector<4x32xf32> -> vector<4x32xf32>
    %cst_118 = arith.constant 2.000000e-04 : f32
    %322 = vector.broadcast %cst_118 : f32 to vector<4x32xf32>
    %323 = arith.mulf %322, %303 : vector<4x32xf32>
    %324 = arith.addf %321, %323 : vector<4x32xf32>
    %cst_119 = arith.constant dense<0.000000e+00> : vector<4xf32>
    %325 = vector.multi_reduction <add>, %320, %cst_119 [0] : vector<4x4xf32> to vector<4xf32>
    %326 = vector.shape_cast %325 : vector<4xf32> to vector<1x4xf32>
    %cst_120 = arith.constant 2.000000e-04 : f32
    %327 = vector.broadcast %cst_120 : f32 to vector<1x4xf32>
    %328 = arith.mulf %327, %306 : vector<1x4xf32>
    %329 = arith.addf %326, %328 : vector<1x4xf32>
    %cst_121 = arith.constant 9.99999974E-5 : f32
    %330 = vector.broadcast %cst_121 : f32 to vector<4x32xf32>
    %331 = arith.mulf %330, %324 : vector<4x32xf32>
    %332 = arith.subf %303, %331 : vector<4x32xf32>
    %cst_122 = arith.constant 9.99999974E-5 : f32
    %333 = vector.broadcast %cst_122 : f32 to vector<1x4xf32>
    %334 = arith.mulf %333, %329 : vector<1x4xf32>
    %335 = arith.subf %306, %334 : vector<1x4xf32>
    %336 = arith.addf %307, %332 : vector<4x32xf32>
    %337 = arith.addf %308, %335 : vector<1x4xf32>
    %338 = arith.addf %332, %336 : vector<4x32xf32>
    %cst_123 = arith.constant 9.99999974E-5 : f32
    %339 = vector.broadcast %cst_123 : f32 to vector<4x32xf32>
    %340 = arith.mulf %339, %338 : vector<4x32xf32>
    %341 = arith.addf %335, %337 : vector<1x4xf32>
    %cst_124 = arith.constant 9.99999974E-5 : f32
    %342 = vector.broadcast %cst_124 : f32 to vector<1x4xf32>
    %343 = arith.mulf %342, %341 : vector<1x4xf32>
    %cst_125 = arith.constant dense<0.000000e+00> : vector<8x4xf32>
    %344 = tpu.matmul %23, %340, %cst_125 {dimension_numbers = #tpu.dot_dimension_numbers<[1], [1], [0], [0], [0, 0, 1, 0], [], []>} : vector<8x32xf32>, vector<4x32xf32>, vector<8x4xf32> -> vector<8x4xf32>
    %345 = vector.broadcast %343 : vector<1x4xf32> to vector<8x4xf32>
    %346 = arith.addf %344, %345 : vector<8x4xf32>
    %347 = arith.mulf %187, %346 : vector<8x4xf32>
    %348 = arith.mulf %187, %346 : vector<8x4xf32>
    %cst_126 = arith.constant dense<0.000000e+00> : vector<8xf32>
    %349 = vector.multi_reduction <add>, %348, %cst_126 [1] : vector<8x4xf32> to vector<8xf32>
    %350 = vector.shape_cast %349 : vector<8xf32> to vector<8x1xf32>
    %351 = vector.broadcast %350 : vector<8x1xf32> to vector<8x4xf32>
    %352 = arith.mulf %187, %351 : vector<8x4xf32>
    %353 = arith.subf %347, %352 : vector<8x4xf32>
    %cst_127 = arith.constant 1.250000e-01 : f32
    %354 = vector.broadcast %cst_127 : f32 to vector<8x4xf32>
    %355 = arith.mulf %353, %354 : vector<8x4xf32>
    %cst_128 = arith.constant dense<0.000000e+00> : vector<8x32xf32>
    %356 = tpu.matmul %229, %340, %cst_128 {dimension_numbers = #tpu.dot_dimension_numbers<[1], [0], [0], [1], [0, 0, 1, 1], [], []>} : vector<8x4xf32>, vector<4x32xf32>, vector<8x32xf32> -> vector<8x32xf32>
    %cst_129 = arith.constant dense<0.000000e+00> : vector<8x32xf32>
    %357 = tpu.matmul %355, %169, %cst_129 {dimension_numbers = #tpu.dot_dimension_numbers<[1], [0], [0], [1], [0, 0, 1, 1], [], []>} : vector<8x4xf32>, vector<4x32xf32>, vector<8x32xf32> -> vector<8x32xf32>
    %358 = arith.addf %356, %357 : vector<8x32xf32>
    %c0_130 = arith.constant 0 : index
    %c0_131 = arith.constant 0 : index
    %359 = vector.load %arg10[%c0_130, %c0_131] : memref<32x32xf32, #tpu.memory_space<vmem>>, vector<32x32xf32>
    %cst_132 = arith.constant dense<0.000000e+00> : vector<32x32xf32>
    %360 = tpu.matmul %7, %358, %cst_132 {dimension_numbers = #tpu.dot_dimension_numbers<[0], [0], [1], [1], [0, 1, 1, 1], [], []>} : vector<8x32xf32>, vector<8x32xf32>, vector<32x32xf32> -> vector<32x32xf32>
    %361 = arith.subf %248, %360 : vector<32x32xf32>
    %cst_133 = arith.constant 5.000000e-01 : f32
    %362 = vector.broadcast %cst_133 : f32 to vector<32x32xf32>
    %363 = arith.mulf %361, %362 : vector<32x32xf32>
    %364 = arith.addf %359, %363 : vector<32x32xf32>
    %c0_134 = arith.constant 0 : index
    %c0_135 = arith.constant 0 : index
    %365 = vector.load %arg10[%c0_134, %c0_135] : memref<32x32xf32, #tpu.memory_space<vmem>>, vector<32x32xf32>
    tpu.vector_store %arg10[%c0_134, %c0_135], %364 {strides = array<i32>} : memref<32x32xf32, #tpu.memory_space<vmem>>, vector<32x32xf32>,
    return
  }
  func.func @transform_0(%arg0: i32) -> (i32, i32, i32) {
    %c0_i32 = arith.constant 0 : i32
    %c0_i32_0 = arith.constant 0 : i32
    %c0_i32_1 = arith.constant 0 : i32
    return %arg0, %c0_i32, %c0_i32_0 : i32, i32, i32
  }
  func.func @transform_1(%arg0: i32) -> (i32, i32, i32) {
    %c0_i32 = arith.constant 0 : i32
    %c0_i32_0 = arith.constant 0 : i32
    %c0_i32_1 = arith.constant 0 : i32
    return %arg0, %c0_i32, %c0_i32_0 : i32, i32, i32
  }
  func.func @transform_2(%arg0: i32) -> (i32, i32, i32) {
    %c0_i32 = arith.constant 0 : i32
    %c0_i32_0 = arith.constant 0 : i32
    %c0_i32_1 = arith.constant 0 : i32
    return %arg0, %c0_i32, %c0_i32_0 : i32, i32, i32
  }
  func.func @transform_3(%arg0: i32) -> (i32, i32, i32) {
    %c0_i32 = arith.constant 0 : i32
    %c0_i32_0 = arith.constant 0 : i32
    %c0_i32_1 = arith.constant 0 : i32
    return %arg0, %c0_i32, %c0_i32_0 : i32, i32, i32
  }
  func.func @transform_4(%arg0: i32) -> (i32, i32) {
    %c0_i32 = arith.constant 0 : i32
    %c0_i32_0 = arith.constant 0 : i32
    %c0_i32_1 = arith.constant 0 : i32
    return %c0_i32, %c0_i32_0 : i32, i32
  }
  func.func @transform_5(%arg0: i32) -> (i32, i32) {
    %c0_i32 = arith.constant 0 : i32
    %c0_i32_0 = arith.constant 0 : i32
    %c0_i32_1 = arith.constant 0 : i32
    return %c0_i32, %c0_i32_0 : i32, i32
  }
  func.func @transform_6(%arg0: i32) -> (i32, i32) {
    %c0_i32 = arith.constant 0 : i32
    %c0_i32_0 = arith.constant 0 : i32
    %c0_i32_1 = arith.constant 0 : i32
    return %c0_i32, %c0_i32_0 : i32, i32
  }
  func.func @transform_7(%arg0: i32) -> (i32, i32) {
    %c0_i32 = arith.constant 0 : i32
    %c0_i32_0 = arith.constant 0 : i32
    %c0_i32_1 = arith.constant 0 : i32
    return %c0_i32, %c0_i32_0 : i32, i32
  }
  func.func @transform_8(%arg0: i32) -> (i32, i32) {
    %c0_i32 = arith.constant 0 : i32
    %c0_i32_0 = arith.constant 0 : i32
    %c0_i32_1 = arith.constant 0 : i32
    return %c0_i32, %c0_i32_0 : i32, i32
  }
  func.func @transform_9(%arg0: i32) -> (i32, i32) {
    %c0_i32 = arith.constant 0 : i32
    %c0_i32_0 = arith.constant 0 : i32
    %c0_i32_1 = arith.constant 0 : i32
    return %c0_i32, %c0_i32_0 : i32, i32
  }
  func.func @transform_10(%arg0: i32) -> (i32, i32) {
    %c0_i32 = arith.constant 0 : i32
    %c0_i32_0 = arith.constant 0 : i32
    %c0_i32_1 = arith.constant 0 : i32
    return %c0_i32, %c0_i32_0 : i32, i32
  }
  func.func @transform_11(%arg0: i32) -> (i32, i32) {
    %c0_i32 = arith.constant 0 : i32
    %c0_i32_0 = arith.constant 0 : i32
    %c0_i32_1 = arith.constant 0 : i32
    return %c0_i32, %c0_i32_0 : i32, i32
  }
}

</mosaic_0001>

<bundles_post_ra>
// kernel: _forward_impl.1
= control target key start
LH: loop header
LB: loop body
LE: loop exit
PB: predicated region body
PF: predicated region fallthrough
CT: control target
= control target key end

     0   :  { %17 = vsyncpa [#allocation4], 0  ;;  %s2516_s0 = inlined_call_operand.vmem [shape: f32[2,8,32], index: 0, kind: input, shape index: {}]   ;;  %s2517_s1 = inlined_call_operand.vmem [shape: s32[2,8,1], index: 1, kind: input, shape index: {}]   ;;  %s2518_s2 = inlined_call_operand.vmem [shape: f32[2,8,32], index: 2, kind: input, shape index: {}]   ;;  %s2519_s3 = inlined_call_operand.vmem [shape: s32[2,8,1], index: 3, kind: input, shape index: {}]   ;;  %s2520_s4 = inlined_call_operand.vmem [shape: f32[32,32], index: 4, kind: input, shape index: {}]   ;;  %s2521_s5 = inlined_call_operand.vmem [shape: f32[4,32], index: 5, kind: input, shape index: {}]   ;;  %s2522_s6 = inlined_call_operand.vmem [shape: f32[1,4], index: 6, kind: input, shape index: {}]   ;;  %s2523_s7 = inlined_call_operand.hbm [shape: f32[1,1], index: 7, kind: output, shape index: {0}]   ;;  %s2524_s8 = inlined_call_operand.hbm [shape: f32[1,1], index: 8, kind: output, shape index: {1}]   ;;  %s2525_s9 = inlined_call_operand.vmem [shape: f32[32,32], index: 9, kind: output, shape index: {2}]   ;;  %s2526_s10 = inlined_call_operand.hbm [shape: f32[4,32], index: 10, kind: output, shape index: {3}]   ;;  %s2527_s11 = inlined_call_operand.hbm [shape: f32[1,4], index: 11, kind: output, shape index: {4}]  }
   0x1   :  { %18 = vsyncpa [#allocation6], 0 }
   0x2   :  { %19 = vsyncpa [#allocation3], 0 }
   0x3   :  { %20 = vsyncpa [#allocation9], 0  ;;  %s2163_s17 = smov 0  }
   0x4 LB: > { %s2169_s18 = sadd.s32 4294967295, %s2093_s17   ;;  %p1846_p0 = scmp.ge.s32.totalorder %s2093_s17, 1  ;;  %s2093_s17 = sphi %s2163_s17, %s26_s17  }
   0x5   : > { %p351_p1 = scmp.lt.s32.totalorder %s2093_s17, 3 }
   0x7   : > { %p352_p2 = pnand %p1846_p0, %p351_p1 }
   0x8   : > { %p397_p3 = scmp.lt.s32.totalorder (!%p352_p2), %s2169_s18, 1  ;;  %p1851_p4 = scmp.ne.s32.totalorder (!%p352_p2), %s2169_s18, 0 }
   0x9   : > { %355 = sbr.rel (%p352_p2) target bundleno = 5868 (0x16ec), region = 48 }
   0xe   : > { %s398_s19 = scalar_select %p397_p3, %s2169_s18, 1 }
   0xf   : > { %416 = sbr.rel (%p1851_p4) target bundleno = 27 (0x1b), region = 52  ;;  %s2095_s21 = smov (!%p1851_p4), 0.0  }
  0x10   : > { %s2175_s20 = sshll.u32 %s398_s19, 3  ;;  %429 = sst [smem:[#allocation2]] (!%p1851_p4), %s2095_s21 }
  0x11   : > { %s400_s23 = scalar_lea.vmem %s2516_s0, %s2175_s20  ;;  %s404_s26 = scalar_lea.vmem %s2517_s1, %s2175_s20 }
  0x12   : > { %s408_s29 = scalar_lea.vmem %s2518_s2, %s2175_s20  ;;  %s412_s13 = scalar_lea.vmem %s2519_s3, %s2175_s20 }
  0x13   : > { %431 = sst [smem:[#allocation5]] (!%p1851_p4), %s2095_s21 }
  0x14   : > { %v417_v0 = vld [vmem:[%s2521_s5] sm:$0xf]  ;;  %vm418_vm0 = vcmask 257024   ;;  %vm421_vm1 = vcmask 24576   ;;  %vm423_vm2 = vcmask 261120   ;;  %v2096_v2 = vmov 0.0  }
  0x15   : > { %v420_v1 = vld [vmem:[%s2522_s6] sm:$0x1]  ;;  %419 = vst.msk [vmem:[#allocation7] sm:$0xf] %vm418_vm0, %v417_v0 }
  0x16   : > { %422 = vst.msk [vmem:[#allocation8] sm:$0x1] %vm421_vm1, %v420_v1 }
  0x17   : > { %424 = vst.msk [vmem:[%s2525_s9] sm:$0xff] %vm423_vm2, %v2096_v2 }
  0x18   : > { %425 = vst.msk [vmem:[%s2525_s9 + $0x8] sm:$0xff] %vm423_vm2, %v2096_v2 }
  0x19   : > { %426 = vst.msk [vmem:[%s2525_s9 + $0x10] sm:$0xff] %vm423_vm2, %v2096_v2 }
  0x1a   : > { %427 = vst.msk [vmem:[%s2525_s9 + $0x18] sm:$0xff] %vm423_vm2, %v2096_v2 }
  0x1b PF: > { %v435_v3 = vld [vmem:[%s2520_s4 + $0x18] sm:$0xff]  ;;  %v434_v4 = vld [vmem:[%s2520_s4 + $0x10] sm:$0xff]  ;;  %vm454_vm3 = vcmask 261120   ;;  %v433_v6 = vld [vmem:[%s2520_s4 + $0x8] sm:$0xff]  ;;  %vm544_vm4 = vcmask 31744   ;;  %v2097_v15 = vmov 0   ;;  %v440_v22 = vlaneseq }
  0x1c   : > { %470 = vmatpush.msra.mxu0 %v435_v3  ;;  %493 = vmatpush.msra.mxu3 %v435_v3  ;;  %v513_v5 = vld [vmem:[#allocation7] sm:$0xf]  ;;  %v2098_v28 = vmov 0.0   ;;  %vm592_vm7 = vcmask 64512   ;;  %vm1153_vm9 = vcmask 1043456   ;;  %vm958_vm10 = vcmask 24576  }
  0x1d   : > { %1858 = vmatpush.xpose.msk.msra.mxu2 %vm454_vm3, %v513_v5  ;;  %v432_v7 = vld [vmem:[%s2520_s4] sm:$0xff]  ;;  %1958 = vset.pattern.permute.xlu1 %v2097_v15  ;;  %v2255_v24 = vand.u32 127, %v440_v22  ;;  %v502_v26 = vshrl.u32 %v440_v22, 7  ;;  %v559_v37 = vmul.f32 0.0002, %v513_v5  ;;  %vm956_vm11 = vcmask 257024  }
  0x1e   : > { %471 = vmatpush.msra.mxu0 %v434_v4  ;;  %494 = vmatpush.msra.mxu3 %v434_v4  ;;  %v436_v8 = vld [vmem:[%s400_s23] sm:$0xff]  ;;  %vm1076_vm12 = vcmask 27648   ;;  %vm1035_vm15 = vcmask 7168   ;;  %s1016_s20 = sld [smem:[#allocation2]]  ;;  %p1934_p5 = scmp.eq.s32.totalorder %s2169_s18, 1 }
  0x1f   : > { %v1960_v10 = vld [vmem:[#allocation8] ss:$0 sm:$0xff]  ;;  %vm504_vm6 = vcmp.lt.s32.totalorder %v502_v26, 4  ;;  %vm508_vm8 = vcmp.ge.s32.totalorder %v502_v26, 4  ;;  %s1034_s24 = sld [smem:[#allocation5]]  ;;  %s2099_s23 = smov [#allocation7]  }
  0x20   : > { %472 = vmatpush.msra.mxu0 %v433_v6  ;;  %495 = vmatpush.msra.mxu3 %v433_v6  ;;  %v438_v14 = vld [vmem:[%s404_s26] sm:$0xff]  ;;  %v2262_v31 = vsel %vm504_vm6, 1.0, %v2098_v28  ;;  %v2276_v2 = vsel %vm508_vm8, 1.0, %v2098_v28  ;;  %s1711_s12 = sshll.u32 %s2099_s23, 4  ;;  %s1713_s26 = sshll.u32 %s2526_s10, 4  ;;  %s1712_s12 = int_to_ptr.vmem [resolvable:$true] %s1711_s12  ;;  %s1714_s26 = int_to_ptr.hbm [resolvable:$true] %s1713_s26 }
  0x21   : > { %443 = vperm.xlu1 %1958, %v438_v14   ;;  %v2251_v21 = vld [vmem:[%s408_s29] sm:$0xff]  ;;  %s1725_s23 = sshll.u32 %s2527_s11, 4  ;;  %s1726_s23 = int_to_ptr.hbm [resolvable:$true] %s1725_s23 }
  0x22   : > { %473 = vmatpush.msra.mxu0 %v432_v7  ;;  %496 = vmatpush.msra.mxu3 %v432_v7  ;;  %v514_v48 = vld [vmem:[#allocation8] sm:$0x1] }
  0x23   : > { %1854 = vmatmul.msk.f32.vlgmr.msra.gmra.mxu0 %vm454_vm3, %v436_v8  ;;  %1855 = vmatmul.msk.f32.vlgmr.msra.gmra.mxu3 %vm454_vm3, %v2251_v21  ;;  %v623_v49 = vmul.f32 0.0002, %v514_v48 }
  0x93   : > { %v444_v25 = vpop.permute.xlu1 %443 }
  0x94   : > { %vm445_vm5 = vcmp.eq.s32.totalorder %v444_v25, %v2255_v24 }
  0x95   : > { %v2259_v29 = vsel %vm445_vm5, 1.0, %v2098_v28 }
  0xa0   : > { %v2231_v9 = vpop.f32.mrf.mxu0 }
  0xa1   : > { %1859 = vmatmul.msk.f32.vlgmr.msra.gmra.mxu2 %vm454_vm3, %v2231_v9  ;;  %611 = vmatpush.msrb.mxu3 %v2231_v9 }
  0xa2   : > { %720 = vmatpush.msrb.mxu2 %v2231_v9 }
  0xa4   : > { %829 = vmatpush.msra.mxu2 %v2231_v9 }
  0xa6   : > { %v2267_v36 = vpop.f32.mrf.mxu3 }
 0x124   : > { %v541_v11 = vpop.f32.mrf.mxu2 }
 0x125   : > { %v542_v12 = vadd.f32 %v1960_v10, %v541_v11 }
 0x127   : > { %v545_v13 = vsel %vm544_vm4, %v542_v12, -inf }
 0x128   : > { %546 = vmax.xlane.f32.xlu0 %v545_v13 }
 0x19b   : > { %v547_v16 = vpop.xlane.xlu0 %546 }
 0x19c   : > { %v548_v17 = vsub.f32 %v542_v12, %v547_v16 }
 0x19e   : > { %v549_v18 = vmul.f32 1.442695, %v548_v17 }
 0x1a0   : > { %1961 = vpow2.f32 %v549_v18 }
 0x1a6   : > { %v1962_v19 = vpop.eup %1961 }
 0x1a7   : > { %v551_v20 = vsel %vm544_vm4, %v1962_v19, 0.0 }
 0x1a8   : > { %552 = vadd.xlane.f32.xlu0 %v551_v20 }
 0x21b   : > { %v553_v23 = vpop.xlane.xlu0 %552 }
 0x21c   : > { %1963 = vrcp.f32 %v553_v23 }
 0x222   : > { %v1964_v27 = vpop.eup %1963 }
 0x223   : > { %v555_v30 = vmul.f32 %v1964_v27, %v1962_v19 }
 0x225   : > { %v556_v32 = vsub.f32 %v555_v30, %v2259_v29 }
 0x227   : > { %v557_v33 = vmul.f32 %v2262_v31, %v556_v32 }
 0x229   : > { %v558_v34 = vmul.f32 0.25, %v557_v33 }
 0x22b   : > { %560 = vxpose.xlu1.b32.start.end [1/1] (short) (narrow) %v558_v34, 8  ;;  %v616_v42 = vsel %vm544_vm4, %v558_v34, 0.0 }
 0x22c   : > { %v617_v43 = vrot.slane %v616_v42, 4 }
 0x22e   : > { %v618_v44 = vadd.f32 %v617_v43, %v616_v42 }
 0x230   : > { %v619_v45 = vrot.slane %v618_v44, 2 }
 0x232   : > { %v620_v46 = vadd.f32 %v619_v45, %v618_v44 }
 0x234   : > { %v621_v47 = vrot.slane %v620_v46, 1 }
 0x236   : > { %v622_v50 = vadd.f32 %v621_v47, %v620_v46 }
 0x238   : > { %v624_v51 = vadd.f32 %v623_v49, %v622_v50 }
 0x23a   : > { %v627_v52 = vmul.f32 0.1, %v624_v51 }
 0x23c   : > { %v628_v53 = vsub.f32 %v514_v48, %v627_v52  ;;  %v2294_v52 = vrot.slane %v2231_v9, 4 }
 0x23e   : > { %v630_v54 = vperm.slane %v628_v53, 0  ;;  %v732_v22 = vmul.f32 0.0002, %v628_v53 }
 0x2cf   : > { %v576_v35 = vpop.trf.xlu1 }
 0x2d0   : > { %1860 = vmatmul.msk.f32.vlgmr.msrb.gmra.mxu3 %vm592_vm7, %v576_v35 }
 0x353   : > { %v613_v38 = vpop.f32.mrf.mxu3 }
 0x354   : > { %v614_v39 = vadd.f32 %v613_v38, %v559_v37 }
 0x356   : > { %v625_v40 = vmul.f32 0.1, %v614_v39 }
 0x358   : > { %v626_v41 = vsub.f32 %v513_v5, %v625_v40 }
 0x35a   : > { %1861 = vmatpush.xpose.msk.msra.mxu3 %vm454_vm3, %v626_v41  ;;  %v669_v7 = vmul.f32 0.0002, %v626_v41 }
 0x35d   : > { %1862 = vmatmul.msk.f32.vlgmr.msra.gmra.mxu3 %vm454_vm3, %v2231_v9 }
 0x3e0   : > { %v652_v55 = vpop.f32.mrf.mxu3 }
 0x3e1   : > { %v653_v56 = vadd.f32 %v652_v55, %v630_v54 }
 0x3e3   : > { %v655_v57 = vsel %vm544_vm4, %v653_v56, -inf }
 0x3e4   : > { %656 = vmax.xlane.f32.xlu2 %v655_v57 }
 0x457   : > { %v657_v58 = vpop.xlane.xlu2 %656 }
 0x458   : > { %v658_v59 = vsub.f32 %v653_v56, %v657_v58 }
 0x45a   : > { %v659_v60 = vmul.f32 1.442695, %v658_v59 }
 0x45c   : > { %1965 = vpow2.f32 %v659_v60 }
 0x462   : > { %v1966_v61 = vpop.eup %1965 }
 0x463   : > { %v661_v62 = vsel %vm544_vm4, %v1966_v61, 0.0 }
 0x464   : > { %662 = vadd.xlane.f32.xlu2 %v661_v62 }
 0x4d7   : > { %v663_v63 = vpop.xlane.xlu2 %662 }
 0x4d8   : > { %1967 = vrcp.f32 %v663_v63 }
 0x4de   : > { %v1968_v0 = vpop.eup %1967 }
 0x4df   : > { %v665_v1 = vmul.f32 %v1968_v0, %v1966_v61 }
 0x4e1   : > { %v666_v3 = vsub.f32 %v665_v1, %v2259_v29 }
 0x4e3   : > { %v667_v4 = vmul.f32 %v2276_v2, %v666_v3 }
 0x4e5   : > { %v668_v5 = vmul.f32 0.25, %v667_v4 }
 0x4e7   : > { %670 = vxpose.xlu0.b32.start.end [1/1] (short) (narrow) %v668_v5, 8  ;;  %v725_v13 = vsel %vm544_vm4, %v668_v5, 0.0 }
 0x4e8   : > { %v726_v14 = vrot.slane %v725_v13, 4 }
 0x4ea   : > { %v727_v16 = vadd.f32 %v726_v14, %v725_v13 }
 0x4ec   : > { %v728_v17 = vrot.slane %v727_v16, 2 }
 0x4ee   : > { %v729_v18 = vadd.f32 %v728_v17, %v727_v16 }
 0x4f0   : > { %v730_v19 = vrot.slane %v729_v18, 1 }
 0x4f2   : > { %v731_v20 = vadd.f32 %v730_v19, %v729_v18 }
 0x4f4   : > { %v733_v23 = vadd.f32 %v732_v22, %v731_v20 }
 0x4f6   : > { %v736_v25 = vmul.f32 0.1, %v733_v23 }
 0x4f8   : > { %v737_v26 = vsub.f32 %v628_v53, %v736_v25 }
 0x4fa   : > { %v739_v27 = vperm.slane %v737_v26, 0  ;;  %v841_v59 = vmul.f32 0.0002, %v737_v26 }
 0x58b   : > { %v686_v6 = vpop.trf.xlu0 }
 0x58c   : > { %1863 = vmatmul.msk.f32.vlgmr.msrb.gmra.mxu2 %vm592_vm7, %v686_v6 }
 0x58d   : > { %938 = vmatpush.msrb.mxu2 %v2231_v9 }
 0x60f   : > { %v722_v8 = vpop.f32.mrf.mxu2 }
 0x610   : > { %v723_v10 = vadd.f32 %v722_v8, %v669_v7 }
 0x612   : > { %v734_v11 = vmul.f32 0.1, %v723_v10 }
 0x614   : > { %v735_v12 = vsub.f32 %v626_v41, %v734_v11 }
 0x616   : > { %1864 = vmatpush.xpose.msk.msrb.mxu0 %vm454_vm3, %v735_v12  ;;  %v778_v47 = vmul.f32 0.0002, %v735_v12 }
 0x619   : > { %1865 = vmatmul.msk.f32.vlgmr.msrb.gmra.mxu0 %vm454_vm3, %v2231_v9 }
 0x696   : > { %v761_v30 = vpop.f32.mrf.mxu0 }
 0x697   : > { %v762_v32 = vadd.f32 %v761_v30, %v739_v27 }
 0x699   : > { %v764_v33 = vsel %vm544_vm4, %v762_v32, -inf }
 0x69a   : > { %765 = vmax.xlane.f32.xlu2 %v764_v33 }
 0x70d   : > { %v766_v34 = vpop.xlane.xlu2 %765 }
 0x70e   : > { %v767_v35 = vsub.f32 %v762_v32, %v766_v34 }
 0x710   : > { %v768_v37 = vmul.f32 1.442695, %v767_v35 }
 0x712   : > { %1969 = vpow2.f32 %v768_v37 }
 0x718   : > { %v1970_v38 = vpop.eup %1969 }
 0x719   : > { %v770_v39 = vsel %vm544_vm4, %v1970_v38, 0.0 }
 0x71a   : > { %771 = vadd.xlane.f32.xlu2 %v770_v39 }
 0x78d   : > { %v772_v40 = vpop.xlane.xlu2 %771 }
 0x78e   : > { %1971 = vrcp.f32 %v772_v40 }
 0x794   : > { %v1972_v41 = vpop.eup %1971 }
 0x795   : > { %v774_v42 = vmul.f32 %v1972_v41, %v1970_v38 }
 0x797   : > { %v775_v43 = vsub.f32 %v774_v42, %v2259_v29 }
 0x799   : > { %v776_v44 = vmul.f32 %v2262_v31, %v775_v43 }
 0x79b   : > { %v777_v45 = vmul.f32 0.25, %v776_v44 }
 0x79d   : > { %779 = vxpose.xlu2.b32.start.end [1/1] (short) (narrow) %v777_v45, 8  ;;  %v834_v31 = vsel %vm544_vm4, %v777_v45, 0.0 }
 0x79e   : > { %v835_v53 = vrot.slane %v834_v31, 4 }
 0x7a0   : > { %v836_v54 = vadd.f32 %v835_v53, %v834_v31 }
 0x7a2   : > { %v837_v55 = vrot.slane %v836_v54, 2 }
 0x7a4   : > { %v838_v56 = vadd.f32 %v837_v55, %v836_v54 }
 0x7a6   : > { %v839_v57 = vrot.slane %v838_v56, 1 }
 0x7a8   : > { %v840_v58 = vadd.f32 %v839_v57, %v838_v56 }
 0x7aa   : > { %v842_v60 = vadd.f32 %v841_v59, %v840_v58 }
 0x7ac   : > { %v845_v61 = vmul.f32 0.1, %v842_v60 }
 0x7ae   : > { %v846_v62 = vsub.f32 %v737_v26, %v845_v61 }
 0x7b0   : > { %v848_v63 = vperm.slane %v846_v62, 0  ;;  %v950_v25 = vmul.f32 0.0002, %v846_v62 }
 0x836   : > { %v795_v46 = vpop.trf.xlu2 }
 0x837   : > { %1866 = vmatmul.msk.f32.vlgmr.msra.gmra.mxu2 %vm592_vm7, %v795_v46  ;;  %v2327_v46 = vld [vmem:[%s412_s13] sm:$0xff] }
 0x8ba   : > { %v831_v48 = vpop.f32.mrf.mxu2 }
 0x8bb   : > { %v832_v49 = vadd.f32 %v831_v48, %v778_v47 }
 0x8bd   : > { %v843_v50 = vmul.f32 0.1, %v832_v49 }
 0x8bf   : > { %v844_v51 = vsub.f32 %v735_v12, %v843_v50 }
 0x8c1   : > { %1867 = vmatpush.xpose.msk.msrb.mxu3 %vm454_vm3, %v844_v51 }
 0x8c4   : > { %1868 = vmatmul.msk.f32.vlgmr.msrb.gmra.mxu3 %vm454_vm3, %v2231_v9 }
 0x8c5   : > { %1138 = vmatpush.msra.mxu3 %v2267_v36 }
 0x8c7   : > { %1884 = vmatpush.msk.msrb.mxu3 %vm1153_vm9, %v2294_v52 }
 0x947   : > { %v870_v0 = vpop.f32.mrf.mxu3 }
 0x948   : > { %v871_v1 = vadd.f32 %v870_v0, %v848_v63 }
 0x94a   : > { %v873_v9 = vsel %vm544_vm4, %v871_v1, -inf }
 0x94b   : > { %874 = vmax.xlane.f32.xlu0 %v873_v9 }
 0x9be   : > { %v875_v3 = vpop.xlane.xlu0 %874 }
 0x9bf   : > { %v876_v4 = vsub.f32 %v871_v1, %v875_v3 }
 0x9c1   : > { %v877_v5 = vmul.f32 1.442695, %v876_v4 }
 0x9c3   : > { %1973 = vpow2.f32 %v877_v5 }
 0x9c9   : > { %v1974_v6 = vpop.eup %1973 }
 0x9ca   : > { %v879_v7 = vsel %vm544_vm4, %v1974_v6, 0.0 }
 0x9cb   : > { %880 = vadd.xlane.f32.xlu1 %v879_v7 }
 0xa3e   : > { %v881_v8 = vpop.xlane.xlu1 %880 }
 0xa3f   : > { %1975 = vrcp.f32 %v881_v8 }
 0xa45   : > { %v1976_v10 = vpop.eup %1975 }
 0xa46   : > { %v883_v11 = vmul.f32 %v1976_v10, %v1974_v6 }
 0xa48   : > { %v884_v12 = vsub.f32 %v883_v11, %v2259_v29  ;;  %v887_v29 = vmul.f32 0.0002, %v844_v51 }
 0xa4a   : > { %v885_v13 = vmul.f32 %v2276_v2, %v884_v12 }
 0xa4c   : > { %v886_v14 = vmul.f32 0.25, %v885_v13 }
 0xa4e   : > { %888 = vxpose.xlu2.b32.start.end [1/1] (short) (narrow) %v886_v14, 8  ;;  %v943_v16 = vsel %vm544_vm4, %v886_v14, 0.0 }
 0xa4f   : > { %v944_v17 = vrot.slane %v943_v16, 4 }
 0xa51   : > { %v945_v18 = vadd.f32 %v944_v17, %v943_v16 }
 0xa53   : > { %v946_v19 = vrot.slane %v945_v18, 2 }
 0xa55   : > { %v947_v20 = vadd.f32 %v946_v19, %v945_v18 }
 0xa57   : > { %v948_v22 = vrot.slane %v947_v20, 1 }
 0xa59   : > { %v949_v23 = vadd.f32 %v948_v22, %v947_v20 }
 0xa5b   : > { %v951_v26 = vadd.f32 %v950_v25, %v949_v23 }
 0xa5d   : > { %v954_v27 = vmul.f32 0.1, %v951_v26 }
 0xa5f   : > { %v955_v30 = vsub.f32 %v846_v62, %v954_v27 }
 0xa61   : > { %959 = vst.msk [vmem:[#allocation8] sm:$0x1] %vm958_vm10, %v955_v30  ;;  %v961_v37 = vperm.slane %v955_v30, 0 }
 0xae7   : > { %v904_v32 = vpop.trf.xlu2 }
 0xae8   : > { %1869 = vmatmul.msk.f32.vlgmr.msrb.gmra.mxu2 %vm592_vm7, %v904_v32 }
 0xb6b   : > { %v940_v2 = vpop.f32.mrf.mxu2 }
 0xb6c   : > { %v941_v33 = vadd.f32 %v940_v2, %v887_v29 }
 0xb6e   : > { %v952_v34 = vmul.f32 0.1, %v941_v33 }
 0xb70   : > { %v2307_v35 = vsub.f32 %v844_v51, %v952_v34 }
 0xb72   : > { %1870 = vmatpush.xpose.msk.msra.mxu0 %vm454_vm3, %v2307_v35  ;;  %1873 = vmatpush.xpose.msk.msra.mxu1 %vm454_vm3, %v2307_v35  ;;  %957 = vst.msk [vmem:[#allocation7] sm:$0xf] %vm956_vm11, %v2307_v35 }
 0xb73   : > { %1876 = vmatpush.msk.msra.mxu2 %vm1153_vm9, %v2307_v35  ;;  %1923 = dma.vmem_to_hbm [thread:$0]  (%p1934_p5), %s1712_s12, 64, %s1714_s26, [#allocation3]  }
 0xb75   : > { %1871 = vmatmul.msk.f32.vlgmr.msra.gmra.mxu0 %vm454_vm3, %v2267_v36  ;;  %1874 = vmatmul.msk.f32.vlgmr.msra.gmra.mxu1 %vm454_vm3, %v2294_v52 }
 0xbf2   : > { %v986_v38 = vpop.f32.mrf.mxu0  ;;  %v1073_v47 = vpop.f32.mrf.mxu1 }
 0xbf3   : > { %v987_v39 = vadd.f32 %v986_v38, %v961_v37  ;;  %v1074_v48 = vadd.f32 %v1073_v47, %v961_v37 }
 0xbf5   : > { %v989_v40 = vsel %vm544_vm4, %v987_v39, -inf  ;;  %v1077_v49 = vsel %vm1076_vm12, %v1074_v48, -inf }
 0xbf6   : > { %990 = vmax.xlane.f32.xlu2 %v989_v40 }
 0xc69   : > { %v991_v41 = vpop.xlane.xlu2 %990 }
 0xc6a   : > { %v992_v42 = vsub.f32 %v987_v39, %v991_v41 }
 0xc6c   : > { %v993_v43 = vmul.f32 1.442695, %v992_v42 }
 0xc6e   : > { %1977 = vpow2.f32 %v993_v43 }
 0xc74   : > { %v1978_v44 = vpop.eup %1977 }
 0xc75   : > { %v995_v45 = vsel %vm544_vm4, %v1978_v44, 0.0 }
 0xc76   : > { %996 = vadd.xlane.f32.xlu1 %v995_v45 }
 0xc8f   : > { %449 = vperm.xlu1 %1958, %v2327_v46  }
 0xcb9   : > { %1078 = vmax.xlane.f32.xlu1 %v1077_v49 }
 0xce9   : > { %v997_v50 = vpop.xlane.xlu1 %996 }
 0xcea   : > { %1979 = vlog2.f32 %v997_v50 }
 0xceb   : > { %1981 = vrcp.f32 %v997_v50 }
 0xcf0   : > { %v1980_v51 = vpop.eup %1979 }
 0xcf1   : > { %v1001_v31 = vmul.f32 0.6931472, %v1980_v51  ;;  %v1982_v53 = vpop.eup %1981 }
 0xcf2   : > { %v2331_v55 = vmul.f32 %v1982_v53, %v1978_v44 }
 0xcf3   : > { %v1002_v56 = vsub.f32 %v992_v42, %v1001_v31 }
 0xcf4   : > { %v1022_v31 = vsel %vm544_vm4, %v2331_v55, -inf }
 0xd01   : > { %v450_v54 = vpop.permute.xlu1 %449 }
 0xd02   : > { %vm451_vm13 = vcmp.eq.s32.totalorder %v450_v54, %v2255_v24 }
 0xd03   : > { %v1853_v57 = vsel %vm451_vm13, 1.0, %v2098_v28 }
 0xd04   : > { %v1051_v58 = vsub.f32 %v2331_v55, %v1853_v57  ;;  %v2336_v59 = vmul.f32 %v1853_v57, %v1002_v56 }
 0xd06   : > { %v2338_v60 = vmul.f32 0.125, %v1051_v58 }
 0xd08   : > { %1088 = vxpose.xlu0.b32.start.end [1/1] (short) (narrow) %v2338_v60, 8  ;;  %1877 = vmatmul.msk.f32.vlgmr.msra.gmra.mxu2 %vm544_vm4, %v2338_v60  ;;  %v1143_v5 = vsel %vm544_vm4, %v2338_v60, 0.0 }
 0xd09   : > { %v1144_v6 = vrot.slane %v1143_v5, 4 }
 0xd0b   : > { %v1145_v7 = vadd.f32 %v1144_v6, %v1143_v5 }
 0xd0d   : > { %v1146_v8 = vrot.slane %v1145_v7, 2 }
 0xd0f   : > { %v1147_v11 = vadd.f32 %v1146_v8, %v1145_v7 }
 0xd11   : > { %v1148_v12 = vrot.slane %v1147_v11, 1 }
 0xd13   : > { %v1149_v14 = vadd.f32 %v1148_v12, %v1147_v11 }
 0xd15   : > { %v1344_v43 = vmul.f32 0.0002, %v1149_v14 }
 0xd2c   : > { %v1079_v61 = vpop.xlane.xlu1 %1078 }
 0xd2d   : > { %v1080_v62 = vsub.f32 %v1074_v48, %v1079_v61 }
 0xd2f   : > { %v1081_v63 = vmul.f32 1.442695, %v1080_v62 }
 0xd31   : > { %1983 = vpow2.f32 %v1081_v63 }
 0xd37   : > { %v1984_v0 = vpop.eup %1983 }
 0xd38   : > { %v1083_v1 = vsel %vm1076_vm12, %v1984_v0, 0.0 }
 0xd39   : > { %1084 = vadd.xlane.f32.xlu2 %v1083_v1 }
 0xd8b   : > { %v1173_v9 = vpop.f32.mrf.mxu2 }
 0xd8c   : > { %1235 = vmatpush.msrb.mxu0 %v1173_v9 }
 0xdac   : > { %v1104_v3 = vpop.trf.xlu0  ;;  %v1085_v10 = vpop.xlane.xlu2 %1084 }
 0xdad   : > { %1875 = vmatmul.msk.f32.vlgmr.msra.gmra.mxu3 %vm592_vm7, %v1104_v3  ;;  %1985 = vrcp.f32 %v1085_v10 }
 0xdb3   : > { %v1986_v13 = vpop.eup %1985 }
 0xdb4   : > { %v2352_v17 = vmul.f32 %v1986_v13, %v1984_v0 }
 0xe30   : > { %v1140_v4 = vpop.f32.mrf.mxu3 }
 0xe31   : > { %1882 = vmatpush.xpose.msk.msrb.mxu1 %vm454_vm3, %v1140_v4  ;;  %v1279_v30 = vmul.f32 0.0002, %v1140_v4 }
 0xe34   : > { %1883 = vmatmul.msk.f32.vlgmr.msrb.gmra.mxu1 %vm454_vm3, %v2294_v52 }
 0xe35   : > { %1888 = vmatpush.msk.msra.mxu1 %vm1153_vm9, %v2294_v52 }
 0xeb1   : > { %v1269_v16 = vpop.f32.mrf.mxu1 }
 0xeb2   : > { %v1270_v18 = vadd.f32 %v1269_v16, %v1149_v14  ;;  %v1021_v16 = vcvt.s32.f32 %v2255_v24 }
 0xeb4   : > { %v1272_v19 = vmul.f32 %v1270_v18, %v2352_v17 }
 0xeb6   : > { %v1273_v20 = vsel %vm1076_vm12, %v1272_v19, 0.0 }
 0xeb7   : > { %1274 = vadd.xlane.f32.xlu2 %v1273_v20  ;;  %v1004_v20 = vsel %vm544_vm4, %v2336_v59, 0.0 }
 0xf2a   : > { %v1275_v22 = vpop.xlane.xlu2 %1274 }
 0xf2b   : > { %v1276_v23 = vmul.f32 %v1275_v22, %v2352_v17 }
 0xf2d   : > { %v1277_v25 = vsub.f32 %v1272_v19, %v1276_v23 }
 0xf2f   : > { %v1278_v26 = vmul.f32 0.25, %v1277_v25 }
 0xf31   : > { %1280 = vxpose.xlu2.b32.start.end [1/1] (short) (narrow) %v1278_v26, 8  ;;  %v1337_v34 = vsel %vm1076_vm12, %v1278_v26, 0.0 }
 0xf32   : > { %v1338_v37 = vrot.slane %v1337_v34, 4 }
 0xf34   : > { %v1339_v38 = vadd.f32 %v1338_v37, %v1337_v34 }
 0xf36   : > { %v1340_v39 = vrot.slane %v1339_v38, 2 }
 0xf38   : > { %v1341_v40 = vadd.f32 %v1340_v39, %v1339_v38 }
 0xf3a   : > { %v1342_v41 = vrot.slane %v1341_v40, 1 }
 0xf3c   : > { %v1343_v42 = vadd.f32 %v1342_v41, %v1341_v40 }
 0xf3e   : > { %v1345_v44 = vadd.f32 %v1344_v43, %v1343_v42 }
 0xf40   : > { %v1348_v45 = vmul.f32 0.0001, %v1345_v44 }
 0xf42   : > { %v2367_v47 = vsub.f32 %v1149_v14, %v1348_v45 }
 0xf44   : > { %v1445_v7 = vmul.f32 0.0002, %v2367_v47 }
 0xfca   : > { %v1296_v27 = vpop.trf.xlu2 }
 0xfcb   : > { %1885 = vmatmul.msk.f32.vlgmr.msrb.gmra.mxu3 %vm544_vm4, %v1296_v27  ;;  %v1030_v27 = vcvt.s32.f32 %v2327_v46 }
0x104e   : > { %v1334_v32 = vpop.f32.mrf.mxu3 }
0x104f   : > { %v1335_v29 = vadd.f32 %v1334_v32, %v1279_v30 }
0x1051   : > { %v1346_v2 = vmul.f32 0.0001, %v1335_v29 }
0x1053   : > { %v2358_v33 = vsub.f32 %v1140_v4, %v1346_v2 }
0x1055   : > { %1886 = vmatpush.xpose.msk.msrb.mxu2 %vm454_vm3, %v2358_v33  ;;  %v1382_v61 = vmul.f32 0.0002, %v2358_v33 }
0x1058   : > { %1887 = vmatmul.msk.f32.vlgmr.msrb.gmra.mxu2 %vm454_vm3, %v2294_v52 }
0x1059   : > { %1892 = vmatpush.msk.msra.mxu2 %vm1153_vm9, %v2294_v52 }
0x10db   : > { %v1372_v48 = vpop.f32.mrf.mxu2 }
0x10dc   : > { %v1373_v49 = vadd.f32 %v1372_v48, %v2367_v47 }
0x10de   : > { %v1375_v50 = vmul.f32 %v1373_v49, %v2352_v17 }
0x10e0   : > { %v1376_v51 = vsel %vm1076_vm12, %v1375_v50, 0.0 }
0x10e1   : > { %1377 = vadd.xlane.f32.xlu0 %v1376_v51 }
0x10e9   : > { %1023 = vmax.xlane.f32.xlu0 %v1022_v31 }
0x1112   : > { %1176 = vxpose.xlu0.b32.start.end [1/1] (short) (narrow) %v2251_v21, 32 }
0x1154   : > { %v1378_v53 = vpop.xlane.xlu0 %1377 }
0x1155   : > { %v1379_v54 = vmul.f32 %v1378_v53, %v2352_v17 }
0x1157   : > { %v1380_v56 = vsub.f32 %v1375_v50, %v1379_v54 }
0x1159   : > { %v1381_v57 = vmul.f32 0.25, %v1380_v56 }
0x115b   : > { %1383 = vxpose.xlu1.b32.start.end [1/1] (short) (narrow) %v1381_v57, 8 }
0x115c   : > { %v1024_v13 = vpop.xlane.xlu0 %1023 }
0x115d   : > { %vm1025_vm14 = vcmp.ge.f32.partialorder %v2331_v55, %v1024_v13 }
0x115e   : > { %v1026_v18 = vsel %vm1025_vm14, %v1021_v16, 4.0 }
0x115f   : > { %v1027_v19 = vsel %vm544_vm4, %v1026_v18, inf }
0x1179   : > { %1959 = vset.pattern.permute.xlu0 %v2097_v15  ;;  %v1438_v15 = vsel %vm1076_vm12, %v1381_v57, 0.0 }
0x117a   : > { %v1439_v21 = vrot.slane %v1438_v15, 4 }
0x117c   : > { %v1440_v9 = vadd.f32 %v1439_v21, %v1438_v15 }
0x117e   : > { %v1441_v3 = vrot.slane %v1440_v9, 2 }
0x1180   : > { %v1442_v4 = vadd.f32 %v1441_v3, %v1440_v9 }
0x1182   : > { %v1443_v5 = vrot.slane %v1442_v4, 1 }
0x1184   : > { %v1444_v6 = vadd.f32 %v1443_v5, %v1442_v4 }
0x1186   : > { %v1446_v8 = vadd.f32 %v1445_v7, %v1444_v6 }
0x1188   : > { %v1449_v10 = vmul.f32 0.0001, %v1446_v8 }
0x118a   : > { %v2391_v11 = vsub.f32 %v2367_v47, %v1449_v10 }
0x118c   : > { %v1546_v3 = vmul.f32 0.0002, %v2391_v11 }
0x11ff   : > { %v1399_v58 = vpop.trf.xlu1 }
0x1200   : > { %1889 = vmatmul.msk.f32.vlgmr.msra.gmra.mxu1 %vm544_vm4, %v1399_v58 }
0x127d   : > { %v1435_v62 = vpop.f32.mrf.mxu1 }
0x127e   : > { %v1436_v63 = vadd.f32 %v1435_v62, %v1382_v61 }
0x1280   : > { %v1447_v0 = vmul.f32 0.0001, %v1436_v63 }
0x1282   : > { %v2380_v1 = vsub.f32 %v2358_v33, %v1447_v0 }
0x1284   : > { %1890 = vmatpush.xpose.msk.msra.mxu3 %vm454_vm3, %v2380_v1  ;;  %v1483_v51 = vmul.f32 0.0002, %v2380_v1  ;;  %v1451_v56 = vadd.f32 %v2380_v1, %v2358_v33 }
0x1287   : > { %1891 = vmatmul.msk.f32.vlgmr.msra.gmra.mxu3 %vm454_vm3, %v2294_v52 }
0x1288   : > { %1896 = vmatpush.msk.msrb.mxu3 %vm1153_vm9, %v2307_v35 }
0x130a   : > { %v1473_v12 = vpop.f32.mrf.mxu3 }
0x130b   : > { %v1474_v35 = vadd.f32 %v1473_v12, %v2391_v11 }
0x130d   : > { %v1476_v52 = vmul.f32 %v1474_v35, %v2352_v17 }
0x130f   : > { %v1477_v14 = vsel %vm1076_vm12, %v1476_v52, 0.0 }
0x1310   : > { %1478 = vadd.xlane.f32.xlu2 %v1477_v14 }
0x1318   : > { %1028 = vmin.xlane.f32.xlu2 %v1027_v19 }
0x1320   : > { %1005 = vadd.xlane.f32.xlu2 %v1004_v20 }
0x1383   : > { %v1479_v22 = vpop.xlane.xlu2 %1478 }
0x1384   : > { %v1480_v23 = vmul.f32 %v1479_v22, %v2352_v17  ;;  %v2404_v17 = vpop.trf.xlu0 }
0x1385   : > { %1878 = vmatmul.msk.f32.vlgmr.msrb.gmra.mxu0 %vm592_vm7, %v2404_v17 }
0x1386   : > { %v1481_v25 = vsub.f32 %v1476_v52, %v1480_v23  ;;  %v1633_v23 = vld [vmem:[%s2525_s9] sm:$0xff] }
0x1388   : > { %v1482_v26 = vmul.f32 0.25, %v1481_v25 }
0x138a   : > { %1484 = vxpose.xlu1.b32.start.end [1/1] (short) (narrow) %v1482_v26, 8  ;;  %v1539_v63 = vsel %vm1076_vm12, %v1482_v26, 0.0 }
0x138b   : > { %v1029_v30 = vpop.xlane.xlu2 %1028  ;;  %v1540_v0 = vrot.slane %v1539_v63, 4 }
0x138c   : > { %vm1031_vm0 = vcmp.eq.f32.partialorder %v1029_v30, %v1030_v27  ;;  %v2408_v46 = vpop.trf.xlu0 }
0x138d   : > { %v1872_v24 = vsel %vm1031_vm0, 1.0, %v2098_v28  ;;  %1879 = vmatmul.msk.f32.gmra.mxu0 %vm592_vm7, %v2408_v46  ;;  %v1541_v15 = vadd.f32 %v1540_v0, %v1539_v63 }
0x138e   : > { %v1036_v32 = vsel %vm1035_vm15, %v1872_v24, 0.0 }
0x138f   : > { %1037 = vadd.xlane.f32.xlu0 %v1036_v32  ;;  %v1542_v33 = vrot.slane %v1541_v15, 2  ;;  %v1634_v32 = vld [vmem:[%s2525_s9 + $0x8] sm:$0xff] }
0x1391   : > { %v1543_v21 = vadd.f32 %v1542_v33, %v1541_v15 }
0x1393   : > { %v1006_v29 = vpop.xlane.xlu2 %1005 }
0x1394   : > { %v1007_v2 = vrot.slane %v1006_v29, 4  ;;  %v2412_v28 = vpop.trf.xlu0 }
0x1395   : > { %1880 = vmatmul.msk.f32.gmra.mxu0 %vm592_vm7, %v2412_v28 }
0x1396   : > { %v1008_v34 = vadd.f32 %v1007_v2, %v1006_v29 }
0x1398   : > { %v1009_v59 = vrot.slane %v1008_v34, 2 }
0x139a   : > { %v1010_v37 = vadd.f32 %v1009_v59, %v1008_v34 }
0x139c   : > { %v1011_v38 = vrot.slane %v1010_v37, 1  ;;  %v2416_v40 = vpop.trf.xlu0 }
0x139d   : > { %1881 = vmatmul.msk.f32.gmra.mxu0 %vm592_vm7, %v2416_v40 }
0x139e   : > { %v1012_v39 = vadd.f32 %v1011_v38, %v1010_v37  ;;  %v1635_v38 = vld [vmem:[%s2525_s9 + $0x10] sm:$0xff] }
0x13a0   : > { %1914 = vpush %v1012_v39 }
0x13d1   : > { %s1915_s13 = spop %1914 }
0x13d2   : > { %s1014_s16 = ssub.f32 0.0, %s1915_s13  ;;  %s1688_s13 = sshll.u32 %s2523_s7, 4  ;;  %s1689_s13 = int_to_ptr.hbm [resolvable:$true] %s1688_s13 }
0x13d4   : > { %s1015_s19 = smul.f32 0.125, %s1014_s16  ;;  %s2100_s16 = smov [#allocation2]  }
0x13d6   : > { %s1017_s21 = smul.f32 0.5, %s1015_s19 }
0x13d8   : > { %s1018_s22 = sadd.f32 %s1017_s21, %s1016_s20 }
0x13da   : > { %1020 = sst [smem:[#allocation2]] %s1018_s22  ;;  %s1698_s22 = sshll.u32 %s2524_s8, 4  ;;  %s1699_s22 = int_to_ptr.hbm [resolvable:$true] %s1698_s22 }
0x13db   : > { %1919 = dma.smem_to_hbm (%p1934_p5), %s2100_s16, 16, %s1689_s13, [#allocation4]  }
0x1402   : > { %v1038_v41 = vpop.xlane.xlu0 %1037 }
0x1403   : > { %v1039_v42 = vrot.slane %v1038_v41, 4 }
0x1405   : > { %v1040_v43 = vadd.f32 %v1039_v42, %v1038_v41  ;;  %v1636_v41 = vld [vmem:[%s2525_s9 + $0x18] sm:$0xff] }
0x1407   : > { %v1041_v44 = vrot.slane %v1040_v43, 2 }
0x1409   : > { %v1042_v45 = vadd.f32 %v1041_v44, %v1040_v43 }
0x140b   : > { %v1043_v48 = vrot.slane %v1042_v45, 1 }
0x140d   : > { %v1044_v49 = vadd.f32 %v1043_v48, %v1042_v45 }
0x140f   : > { %1916 = vpush %v1044_v49 }
0x142e   : > { %v1500_v50 = vpop.trf.xlu1 }
0x142f   : > { %1893 = vmatmul.msk.f32.vlgmr.msra.gmra.mxu2 %vm544_vm4, %v1500_v50 }
0x1440   : > { %s1917_s25 = spop %1916 }
0x1441   : > { %s1046_s27 = smul.f32 0.125, %s1917_s25 }
0x1443   : > { %s1047_s28 = smul.f32 0.5, %s1046_s27  ;;  %s2102_s27 = smov [#allocation5]  }
0x1445   : > { %s1048_s30 = sadd.f32 %s1047_s28, %s1034_s24  ;;  %s2101_s24 = smov [#allocation8]  }
0x1446   : > { %s1723_s25 = sshll.u32 %s2101_s24, 4  ;;  %s1724_s25 = int_to_ptr.vmem [resolvable:$true] %s1723_s25 }
0x1447   : > { %1050 = sst [smem:[#allocation5]] %s1048_s30 }
0x1448   : > { %1921 = dma.smem_to_hbm (%p1934_p5), %s2102_s27, 16, %s1699_s22, [#allocation6]  }
0x1449   : > { %1925 = dma.vmem_to_hbm [thread:$0]  (%p1934_p5), %s1724_s25, 16, %s1726_s23, [#allocation9]  }
0x14b2   : > { %v1536_v31 = vpop.f32.mrf.mxu2 }
0x14b3   : > { %v1537_v53 = vadd.f32 %v1536_v31, %v1483_v51 }
0x14b5   : > { %v1548_v54 = vmul.f32 0.0001, %v1537_v53 }
0x14b7   : > { %v1549_v57 = vsub.f32 %v2380_v1, %v1548_v54  ;;  %v1544_v1 = vrot.slane %v1543_v21, 1 }
0x14b9   : > { %v1552_v58 = vadd.f32 %v1549_v57, %v1451_v56  ;;  %v1545_v9 = vadd.f32 %v1544_v1, %v1543_v21 }
0x14bb   : > { %v1554_v61 = vadd.f32 %v1552_v58, %v1549_v57  ;;  %v1547_v4 = vadd.f32 %v1546_v3, %v1545_v9 }
0x14bd   : > { %v1555_v62 = vmul.f32 0.0001, %v1554_v61  ;;  %v1550_v5 = vmul.f32 0.0001, %v1547_v4 }
0x14bf   : > { %1894 = vmatpush.xpose.msk.msrb.mxu1 %vm454_vm3, %v1555_v62  ;;  %1898 = vmatpush.msk.msrb.mxu2 %vm1153_vm9, %v1555_v62  ;;  %v1551_v6 = vsub.f32 %v2391_v11, %v1550_v5 }
0x14c0   : > { %1899 = vmatmul.msk.f32.vlgmr.msrb.gmra.mxu2 %vm544_vm4, %v2338_v60  ;;  %v1452_v60 = vadd.f32 %v2391_v11, %v2367_v47 }
0x14c2   : > { %1895 = vmatmul.msk.f32.vlgmr.msrb.gmra.mxu1 %vm454_vm3, %v2267_v36  ;;  %v1553_v7 = vadd.f32 %v1551_v6, %v1452_v60 }
0x14c4   : > { %v1556_v8 = vadd.f32 %v1553_v7, %v1551_v6 }
0x14c6   : > { %v1557_v36 = vmul.f32 0.0001, %v1556_v8 }
0x153f   : > { %v1578_v10 = vpop.f32.mrf.mxu1 }
0x1540   : > { %v1579_v12 = vadd.f32 %v1578_v10, %v1557_v36 }
0x1542   : > { %v1581_v35 = vmul.f32 %v1579_v12, %v2331_v55 }
0x1543   : > { %v1630_v47 = vpop.f32.mrf.mxu2 }
0x1544   : > { %v1582_v52 = vsel %vm544_vm4, %v1581_v35, 0.0 }
0x1545   : > { %1583 = vadd.xlane.f32.xlu1 %v1582_v52 }
0x15b8   : > { %v1584_v13 = vpop.xlane.xlu1 %1583 }
0x15b9   : > { %v1585_v14 = vmul.f32 %v1584_v13, %v2331_v55  ;;  %v1237_v55 = vpop.f32.mrf.mxu0 }
0x15bb   : > { %v1586_v16 = vsub.f32 %v1581_v35, %v1585_v14 }
0x15bd   : > { %v1587_v18 = vmul.f32 0.125, %v1586_v16 }
0x15bf   : > { %1897 = vmatmul.msk.f32.vlgmr.msrb.gmra.mxu3 %vm544_vm4, %v1587_v18 }
0x15c1   : > { %v1240_v25 = vpop.f32.mrf.mxu0 }
0x15c9   : > { %v1243_v2 = vpop.f32.mrf.mxu0 }
0x1642   : > { %v1608_v11 = vpop.f32.mrf.mxu3 }
0x1643   : > { %v1631_v19 = vadd.f32 %v1630_v47, %v1608_v11 }
0x1645   : > { %1652 = vmatpush.msra.mxu1 %v1631_v19 }
0x1646   : > { %1900 = vmatmul.msk.f32.vlgmr.msra.gmra.mxu1 %vm592_vm7, %v2404_v17 }
0x164e   : > { %1901 = vmatmul.msk.f32.gmra.mxu1 %vm592_vm7, %v2408_v46  ;;  %v1246_v46 = vpop.f32.mrf.mxu0 }
0x1656   : > { %1902 = vmatmul.msk.f32.gmra.mxu1 %vm592_vm7, %v2412_v28 }
0x165e   : > { %1903 = vmatmul.msk.f32.gmra.mxu1 %vm592_vm7, %v2416_v40 }
0x16c3   : > { %v1654_v20 = vpop.f32.mrf.mxu1 }
0x16c4   : > { %v1666_v22 = vsub.f32 %v1237_v55, %v1654_v20 }
0x16c6   : > { %v1670_v26 = vmul.f32 0.5, %v1666_v22 }
0x16c8   : > { %v1674_v27 = vadd.f32 %v1670_v26, %v1633_v23 }
0x16ca   : > { %1678 = vst.msk [vmem:[%s2525_s9] sm:$0xff] %vm454_vm3, %v1674_v27 }
0x16cb   : > { %v1657_v30 = vpop.f32.mrf.mxu1 }
0x16cc   : > { %v1667_v24 = vsub.f32 %v1240_v25, %v1657_v30 }
0x16ce   : > { %v1671_v29 = vmul.f32 0.5, %v1667_v24 }
0x16d0   : > { %v1675_v34 = vadd.f32 %v1671_v29, %v1634_v32 }
0x16d2   : > { %1679 = vst.msk [vmem:[%s2525_s9 + $0x8] sm:$0xff] %vm454_vm3, %v1675_v34 }
0x16d3   : > { %v1660_v59 = vpop.f32.mrf.mxu1 }
0x16d4   : > { %v1668_v37 = vsub.f32 %v1243_v2, %v1660_v59 }
0x16d6   : > { %v1672_v39 = vmul.f32 0.5, %v1668_v37 }
0x16d8   : > { %v1676_v17 = vadd.f32 %v1672_v39, %v1635_v38 }
0x16da   : > { %1680 = vst.msk [vmem:[%s2525_s9 + $0x10] sm:$0xff] %vm454_vm3, %v1676_v17 }
0x16db   : > { %v1663_v28 = vpop.f32.mrf.mxu1 }
0x16dc   : > { %v1669_v40 = vsub.f32 %v1246_v46, %v1663_v28 }
0x16de   : > { %v1673_v42 = vmul.f32 0.5, %v1669_v40 }
0x16e0   : > { %v1677_v43 = vadd.f32 %v1673_v42, %v1636_v41 }
0x16e2   : > { %1681 = vst.msk [vmem:[%s2525_s9 + $0x18] sm:$0xff] %vm454_vm3, %v1677_v43 }
0x16e3   : > { %2076 = dma.done.wait (%p1934_p5), [#allocation4], 16  }
0x16e4   : > { %2078 = vsyncadd (%p1934_p5), [#allocation4], 4294967280 }
0x16e5   : > { %2080 = dma.done.wait (%p1934_p5), [#allocation6], 16  }
0x16e6   : > { %2082 = vsyncadd (%p1934_p5), [#allocation6], 4294967280 }
0x16e7   : > { %2084 = dma.done.wait (%p1934_p5), [#allocation3], 64  }
0x16e8   : > { %2086 = vsyncadd (%p1934_p5), [#allocation3], 4294967232 }
0x16e9   : > { %2088 = dma.done.wait (%p1934_p5), [#allocation9], 16  }
0x16ea   : > { %2090 = vsyncadd (%p1934_p5), [#allocation9], 4294967280 }
0x16eb   : > { %1752 = sfence }
0x16ec PF: > { %s26_s17 = sadd.s32 1, %s2093_s17  }
0x16ed   : > { %p23_p6 = scmp.ge.s32.totalorder %s26_s17, 4  }
0x16ef   :  { %25 = sbr.rel (!%p23_p6) target bundleno = 4 (0x4), region = 125 }
0x16f4   :  { %1758 = vsyncpa [#allocation3], 1 }
0x16f5   :  { %1760 = vsyncpa [#allocation3 + $0x1], 1 }
0x16f6   :  { %1761 = vsyncpa [#allocation9], 1 }
0x16f7   :  { %1762 = vsyncpa [#allocation4], 1 }
0x16f8   :  { %1764 = vsyncpa [#allocation4 + $0x1], 1 }
0x16f9   :  { %1765 = vsyncpa [#allocation6], 1 }

</bundles_post_ra>
